<compile_context>
chip_gen: v7x
topology: tpu7x:2x2x1
jax: 0.10.0
libtpu: 0.0.40
codegen_flags: <defaults>
</compile_context>

<pallas_src>
import functools

import jax
import jax.numpy as jnp
from jax import lax
from jax.experimental import pallas as pl
from jax.experimental.pallas import tpu as pltpu

DIST_WEIGHT = 1.0
ANGLE_WEIGHT = 1.0
EPS_PDIST = 1e-12   # clamp in pdist (torch .clamp(min=eps))
EPS_NORM = 1e-12    # F.normalize default eps
TD_OFFSET = 1e-6    # "+ 1e-06" added to the teacher pairwise differences


# ---------------- in-kernel helpers (traced inside the Pallas body) -----------

def _diag_mask(n):
    row = lax.broadcasted_iota(jnp.int32, (n, n), 0)
    col = lax.broadcasted_iota(jnp.int32, (n, n), 1)
    return row == col


def _normalized_pdist(e, eye):
    """pdist(e, squared=False) with zeroed diagonal, divided by mean of >0 entries.

    Squared row norms come from the gram diagonal (no extra lane-axis reduction
    over D); the normalization divide is a single scalar reciprocal + multiply.
    """
    prod = lax.dot_general(e, e, (((1,), (1,)), ((), ())),
                           preferred_element_type=jnp.float32)        # (N, N) on MXU
    e_sq = jnp.sum(jnp.where(eye, prod, 0.0), axis=-1)                # diag(prod)
    res = jnp.maximum(e_sq[:, None] + e_sq[None, :] - 2.0 * prod, EPS_PDIST)
    res = jnp.sqrt(res)
    res = jnp.where(eye, 0.0, res)                                    # zero diagonal
    pos = res > 0.0
    mean_pos = jnp.sum(jnp.where(pos, res, 0.0)) / jnp.sum(pos.astype(jnp.float32))
    return res * (1.0 / mean_pos)


def _angle_tile(full, anchors, offset, eye):
    """Angle tensor for a tile of anchors: (TI, N, N).

    Normalization folded into the gram: a[j,k] = R[j,k] * rsqrt(R[j,j]) * rsqrt(R[k,k]).
    """
    diff = full[None, :, :] - anchors[:, None, :]                     # (TI, N, D)
    if offset:
        diff = diff + offset
    gram = jnp.einsum('ajd,akd->ajk', diff, diff,
                      preferred_element_type=jnp.float32)             # (TI, N, N) MXU
    diag = jnp.sum(jnp.where(eye[None, :, :], gram, 0.0), axis=-1)    # (TI, N) sq norms
    inv = lax.rsqrt(jnp.maximum(diag, EPS_NORM * EPS_NORM))           # EUP rsqrt
    return gram * inv[:, :, None] * inv[:, None, :]


# ------------------------------- Pallas kernel --------------------------------

def relation_loss_kernel(student_ref, teacher_ref, out_ref, *, anchor_tile, n):
    tile = pl.program_id(0)
    start = pl.multiple_of(tile * anchor_tile, anchor_tile)

    s = student_ref[...].astype(jnp.float32)
    t = teacher_ref[...].astype(jnp.float32)
    s_anchor = student_ref[pl.ds(start, anchor_tile), :].astype(jnp.float32)
    t_anchor = teacher_ref[pl.ds(start, anchor_tile), :].astype(jnp.float32)

    eye = _diag_mask(n)  # shared diagonal mask (hoisted, reused by all terms)

    # RKdAngle (mode_angle='L2'): partial sum of squared diffs over this anchor tile.
    a_s = _angle_tile(s, s_anchor, 0.0, eye)
    a_t = _angle_tile(t, t_anchor, TD_OFFSET, eye)
    angle_part = jnp.sum((a_s - a_t) ** 2) * (ANGLE_WEIGHT / float(n) ** 3)

    # RkdDistance (mode_dis='L2'): computed once, folded into grid step 0's partial.
    @pl.when(tile == 0)
    def _():
        d_s = _normalized_pdist(s, eye)
        d_t = _normalized_pdist(t, eye)
        dist_part = jnp.sum((d_s - d_t) ** 2) * (DIST_WEIGHT / float(n * n))
        out_ref[...] = jnp.full(out_ref.shape, angle_part + dist_part, jnp.float32)

    @pl.when(tile != 0)
    def _():
        out_ref[...] = jnp.full(out_ref.shape, angle_part, jnp.float32)


def relation_loss(student, teacher, *, anchor_tile=None):
    n, d = student.shape
    assert teacher.shape == (n, d)
    if anchor_tile is None:
        anchor_tile = next(t for t in (8, 4, 2, 1) if n % t == 0)
    num_tiles = n // anchor_tile

    kernel = functools.partial(relation_loss_kernel, anchor_tile=anchor_tile, n=n)
    partials = pl.pallas_call(
        kernel,
        out_shape=jax.ShapeDtypeStruct((num_tiles, 8, 128), jnp.float32),
        grid=(num_tiles,),
        in_specs=[
            pl.BlockSpec((n, d), lambda i: (0, 0)),   # resident across all steps
            pl.BlockSpec((n, d), lambda i: (0, 0)),
        ],
        # Lane-dense per-tile partial-sum block (avoids masked narrow vst).
        out_specs=pl.BlockSpec((1, 8, 128), lambda i: (i, 0, 0)),
        compiler_params=pltpu.CompilerParams(
            dimension_semantics=("parallel",),
            vmem_limit_bytes=32 * 1024 * 1024,
        ),
    )(student, teacher)
    # Each tile's block is filled with its scalar partial; sum lane-0 entries.
    return jnp.sum(partials[:, 0, 0])


# ----------------------------- pure-JAX reference -----------------------------

def _pdist_norm_ref(e):
    e_sq = jnp.sum(e ** 2, axis=1)
    prod = e @ e.T
    res = jnp.sqrt(jnp.maximum(e_sq[:, None] + e_sq[None, :] - 2.0 * prod, EPS_PDIST))
    idx = jnp.arange(e.shape[0])
    res = res.at[idx, idx].set(0.0)
    mean_pos = jnp.sum(jnp.where(res > 0, res, 0.0)) / jnp.sum(
        (res > 0).astype(jnp.float32))
    return res / mean_pos


def _angle_ref(e, offset):
    diff = e[None, :, :] - e[:, None, :] + offset
    norm = jnp.linalg.norm(diff, axis=2, keepdims=True)
    diff = diff / jnp.maximum(norm, EPS_NORM)
    return jnp.einsum('ijd,ikd->ijk', diff, diff)


def relation_loss_ref(student, teacher):
    dis = jnp.mean((_pdist_norm_ref(student) - _pdist_norm_ref(teacher)) ** 2)
    ang = jnp.mean((_angle_ref(student, 0.0) - _angle_ref(teacher, TD_OFFSET)) ** 2)
    return DIST_WEIGHT * dis + ANGLE_WEIGHT * ang


# ------------------------------------ main -------------------------------------

if __name__ == "__main__":
    key = jax.random.PRNGKey(0)
    k1, k2 = jax.random.split(key)
    N, D = 16, 32  # batch of 16 embeddings, hidden dim 32 (2 anchor tiles of 8)
    student = jax.random.normal(k1, (N, D), dtype=jnp.float32)
    teacher = jax.random.normal(k2, (N, D), dtype=jnp.float32)

    loss = relation_loss(student, teacher)
    jax.block_until_ready(loss)

    ref = relation_loss_ref(student, teacher)
    assert jnp.allclose(loss, ref, rtol=1e-4, atol=1e-5), (float(loss), float(ref))

    print("KERNEL_OK")
</pallas_src>

<mosaic_0001>
module attributes {stable_mosaic.version = 11 : i64} {
  func.func @relation_loss_kernel(%arg0: i32, %arg1: memref<16x32xf32, #tpu.memory_space<vmem>>, %arg2: memref<16x32xf32, #tpu.memory_space<vmem>>, %arg3: memref<1x8x128xf32, #tpu.memory_space<vmem>>) attributes {dimension_semantics = [#tpu.dimension_semantics<parallel>], iteration_bounds = array<i64: 2>, scalar_prefetch = 0 : i64, scratch_operands = 0 : i64, tpu.core_type = #tpu.core_type<tc>, window_params = [{pipeline_mode = #tpu.pipeline_mode<synchronous>, transform_indices = @transform_0, window_bounds = array<i64: 16, 32>}, {pipeline_mode = #tpu.pipeline_mode<synchronous>, transform_indices = @transform_1, window_bounds = array<i64: 16, 32>}, {transform_indices = @transform_2, window_bounds = array<i64: 1, 8, 128>}]} {
    %c8_i32 = arith.constant 8 : i32
    %0 = arith.muli %arg0, %c8_i32 : i32
    %1 = tpu.assume_multiple %0, 8 : i32
    %c0 = arith.constant 0 : index
    %c0_0 = arith.constant 0 : index
    %2 = vector.load %arg1[%c0, %c0_0] : memref<16x32xf32, #tpu.memory_space<vmem>>, vector<16x32xf32>
    %c0_1 = arith.constant 0 : index
    %c0_2 = arith.constant 0 : index
    %3 = vector.load %arg2[%c0_1, %c0_2] : memref<16x32xf32, #tpu.memory_space<vmem>>, vector<16x32xf32>
    %4 = arith.index_cast %1 : i32 to index
    %c0_3 = arith.constant 0 : index
    %5 = vector.load %arg1[%4, %c0_3] : memref<16x32xf32, #tpu.memory_space<vmem>>, vector<8x32xf32>
    %6 = arith.index_cast %1 : i32 to index
    %c0_4 = arith.constant 0 : index
    %7 = vector.load %arg2[%6, %c0_4] : memref<16x32xf32, #tpu.memory_space<vmem>>, vector<8x32xf32>
    %8 = tpu.iota {dimensions = array<i32: 0>} : vector<16x16xi32>
    %9 = tpu.iota {dimensions = array<i32: 1>} : vector<16x16xi32>
    %10 = arith.cmpi eq, %8, %9 : vector<16x16xi32>
    %11 = vector.shape_cast %2 : vector<16x32xf32> to vector<1x16x32xf32>
    %12 = vector.shape_cast %5 : vector<8x32xf32> to vector<8x1x32xf32>
    %13 = vector.broadcast %11 : vector<1x16x32xf32> to vector<8x16x32xf32>
    %14 = vector.broadcast %12 : vector<8x1x32xf32> to vector<8x16x32xf32>
    %15 = arith.subf %13, %14 : vector<8x16x32xf32>
    "tpu.trace_start"() <{level = 10 : i32, message = "ajd,akd->ajk"}> : () -> ()
    %cst = arith.constant dense<0.000000e+00> : vector<8x16x16xf32>
    %16 = tpu.matmul %15, %15, %cst {dimension_numbers = #tpu.dot_dimension_numbers<[2], [2], [1], [1], [0, 0, 0, 1, 1, 1], [0], [0]>} : vector<8x16x32xf32>, vector<8x16x32xf32>, vector<8x16x16xf32> -> vector<8x16x16xf32>
    "tpu.trace_stop"() : () -> ()
    %17 = vector.shape_cast %10 : vector<16x16xi1> to vector<1x16x16xi1>
    %cst_5 = arith.constant 0.000000e+00 : f32
    %18 = vector.shape_cast %17 : vector<1x16x16xi1> to vector<1x16x16xi1>
    %19 = vector.broadcast %18 : vector<1x16x16xi1> to vector<8x16x16xi1>
    %20 = vector.broadcast %cst_5 : f32 to vector<8x16x16xf32>
    %21 = arith.select %19, %16, %20 : vector<8x16x16xi1>, vector<8x16x16xf32>
    %cst_6 = arith.constant dense<0.000000e+00> : vector<8x16xf32>
    %22 = vector.multi_reduction <add>, %21, %cst_6 [2] : vector<8x16x16xf32> to vector<8x16xf32>
    %cst_7 = arith.constant 1.000000e-24 : f32
    %23 = vector.broadcast %cst_7 : f32 to vector<8x16xf32>
    %24 = arith.maximumf %22, %23 : vector<8x16xf32>
    %25 = math.rsqrt %24 : vector<8x16xf32>
    %26 = vector.shape_cast %25 : vector<8x16xf32> to vector<8x16x1xf32>
    %27 = vector.broadcast %26 : vector<8x16x1xf32> to vector<8x16x16xf32>
    %28 = arith.mulf %16, %27 : vector<8x16x16xf32>
    %29 = vector.shape_cast %25 : vector<8x16xf32> to vector<8x1x16xf32>
    %30 = vector.broadcast %29 : vector<8x1x16xf32> to vector<8x16x16xf32>
    %31 = arith.mulf %28, %30 : vector<8x16x16xf32>
    %32 = vector.shape_cast %3 : vector<16x32xf32> to vector<1x16x32xf32>
    %33 = vector.shape_cast %7 : vector<8x32xf32> to vector<8x1x32xf32>
    %34 = vector.broadcast %32 : vector<1x16x32xf32> to vector<8x16x32xf32>
    %35 = vector.broadcast %33 : vector<8x1x32xf32> to vector<8x16x32xf32>
    %36 = arith.subf %34, %35 : vector<8x16x32xf32>
    %cst_8 = arith.constant 9.99999997E-7 : f32
    %37 = vector.broadcast %cst_8 : f32 to vector<8x16x32xf32>
    %38 = arith.addf %36, %37 : vector<8x16x32xf32>
    "tpu.trace_start"() <{level = 10 : i32, message = "ajd,akd->ajk"}> : () -> ()
    %cst_9 = arith.constant dense<0.000000e+00> : vector<8x16x16xf32>
    %39 = tpu.matmul %38, %38, %cst_9 {dimension_numbers = #tpu.dot_dimension_numbers<[2], [2], [1], [1], [0, 0, 0, 1, 1, 1], [0], [0]>} : vector<8x16x32xf32>, vector<8x16x32xf32>, vector<8x16x16xf32> -> vector<8x16x16xf32>
    "tpu.trace_stop"() : () -> ()
    %40 = vector.shape_cast %10 : vector<16x16xi1> to vector<1x16x16xi1>
    %cst_10 = arith.constant 0.000000e+00 : f32
    %41 = vector.shape_cast %40 : vector<1x16x16xi1> to vector<1x16x16xi1>
    %42 = vector.broadcast %41 : vector<1x16x16xi1> to vector<8x16x16xi1>
    %43 = vector.broadcast %cst_10 : f32 to vector<8x16x16xf32>
    %44 = arith.select %42, %39, %43 : vector<8x16x16xi1>, vector<8x16x16xf32>
    %cst_11 = arith.constant dense<0.000000e+00> : vector<8x16xf32>
    %45 = vector.multi_reduction <add>, %44, %cst_11 [2] : vector<8x16x16xf32> to vector<8x16xf32>
    %cst_12 = arith.constant 1.000000e-24 : f32
    %46 = vector.broadcast %cst_12 : f32 to vector<8x16xf32>
    %47 = arith.maximumf %45, %46 : vector<8x16xf32>
    %48 = math.rsqrt %47 : vector<8x16xf32>
    %49 = vector.shape_cast %48 : vector<8x16xf32> to vector<8x16x1xf32>
    %50 = vector.broadcast %49 : vector<8x16x1xf32> to vector<8x16x16xf32>
    %51 = arith.mulf %39, %50 : vector<8x16x16xf32>
    %52 = vector.shape_cast %48 : vector<8x16xf32> to vector<8x1x16xf32>
    %53 = vector.broadcast %52 : vector<8x1x16xf32> to vector<8x16x16xf32>
    %54 = arith.mulf %51, %53 : vector<8x16x16xf32>
    %55 = arith.subf %31, %54 : vector<8x16x16xf32>
    %56 = arith.mulf %55, %55 : vector<8x16x16xf32>
    %57 = vector.shape_cast %56 : vector<8x16x16xf32> to vector<1x8x16x16xf32>
    %cst_13 = arith.constant dense<0.000000e+00> : vector<1xf32>
    %58 = vector.multi_reduction <add>, %57, %cst_13 [1, 2, 3] : vector<1x8x16x16xf32> to vector<1xf32>
    %59 = vector.shape_cast %58 : vector<1xf32> to vector<1x1x1x1xf32>
    %60 = vector.extract %59[0, 0, 0, 0] : f32 from vector<1x1x1x1xf32>
    %cst_14 = arith.constant 2.44140625E-4 : f32
    %61 = arith.mulf %60, %cst_14 : f32
    %c0_i32 = arith.constant 0 : i32
    %62 = arith.cmpi eq, %arg0, %c0_i32 : i32
    %63 = arith.extui %62 : i1 to i32
    %c0_i32_15 = arith.constant 0 : i32
    %64 = arith.cmpi ne, %63, %c0_i32_15 : i32
    scf.if %64 {
      %cst_18 = arith.constant dense<0.000000e+00> : vector<16x16xf32>
      %68 = tpu.matmul %2, %2, %cst_18 {dimension_numbers = #tpu.dot_dimension_numbers<[1], [1], [0], [0], [0, 0, 1, 0], [], []>} : vector<16x32xf32>, vector<16x32xf32>, vector<16x16xf32> -> vector<16x16xf32>
      %cst_19 = arith.constant 0.000000e+00 : f32
      %69 = vector.broadcast %cst_19 : f32 to vector<16x16xf32>
      %70 = arith.select %10, %68, %69 : vector<16x16xi1>, vector<16x16xf32>
      %cst_20 = arith.constant dense<0.000000e+00> : vector<16xf32>
      %71 = vector.multi_reduction <add>, %70, %cst_20 [1] : vector<16x16xf32> to vector<16xf32>
      %72 = vector.shape_cast %71 : vector<16xf32> to vector<16x1xf32>
      %73 = vector.shape_cast %71 : vector<16xf32> to vector<1x16xf32>
      %74 = vector.broadcast %72 : vector<16x1xf32> to vector<16x16xf32>
      %75 = vector.broadcast %73 : vector<1x16xf32> to vector<16x16xf32>
      %76 = arith.addf %74, %75 : vector<16x16xf32>
      %cst_21 = arith.constant 2.000000e+00 : f32
      %77 = vector.broadcast %cst_21 : f32 to vector<16x16xf32>
      %78 = arith.mulf %77, %68 : vector<16x16xf32>
      %79 = arith.subf %76, %78 : vector<16x16xf32>
      %cst_22 = arith.constant 9.99999996E-13 : f32
      %80 = vector.broadcast %cst_22 : f32 to vector<16x16xf32>
      %81 = arith.maximumf %79, %80 : vector<16x16xf32>
      %82 = math.sqrt %81 : vector<16x16xf32>
      %cst_23 = arith.constant 0.000000e+00 : f32
      %83 = vector.broadcast %cst_23 : f32 to vector<16x16xf32>
      %84 = arith.select %10, %83, %82 : vector<16x16xi1>, vector<16x16xf32>
      %cst_24 = arith.constant 0.000000e+00 : f32
      %85 = vector.broadcast %cst_24 : f32 to vector<16x16xf32>
      %86 = arith.cmpf ogt, %84, %85 : vector<16x16xf32>
      %cst_25 = arith.constant 0.000000e+00 : f32
      %87 = vector.broadcast %cst_25 : f32 to vector<16x16xf32>
      %88 = arith.select %86, %84, %87 : vector<16x16xi1>, vector<16x16xf32>
      %89 = vector.shape_cast %88 : vector<16x16xf32> to vector<1x16x16xf32>
      %cst_26 = arith.constant dense<0.000000e+00> : vector<1xf32>
      %90 = vector.multi_reduction <add>, %89, %cst_26 [1, 2] : vector<1x16x16xf32> to vector<1xf32>
      %91 = vector.shape_cast %90 : vector<1xf32> to vector<1x1x1xf32>
      %92 = vector.extract %91[0, 0, 0] : f32 from vector<1x1x1xf32>
      %93 = arith.extui %86 : vector<16x16xi1> to vector<16x16xi32>
      %94 = arith.sitofp %93 : vector<16x16xi32> to vector<16x16xf32>
      %95 = vector.shape_cast %94 : vector<16x16xf32> to vector<1x16x16xf32>
      %cst_27 = arith.constant dense<0.000000e+00> : vector<1xf32>
      %96 = vector.multi_reduction <add>, %95, %cst_27 [1, 2] : vector<1x16x16xf32> to vector<1xf32>
      %97 = vector.shape_cast %96 : vector<1xf32> to vector<1x1x1xf32>
      %98 = vector.extract %97[0, 0, 0] : f32 from vector<1x1x1xf32>
      %99 = arith.divf %92, %98 : f32
      %cst_28 = arith.constant 1.000000e+00 : f32
      %100 = arith.divf %cst_28, %99 : f32
      %101 = vector.broadcast %100 : f32 to vector<16x16xf32>
      %102 = arith.mulf %84, %101 : vector<16x16xf32>
      %cst_29 = arith.constant dense<0.000000e+00> : vector<16x16xf32>
      %103 = tpu.matmul %3, %3, %cst_29 {dimension_numbers = #tpu.dot_dimension_numbers<[1], [1], [0], [0], [0, 0, 1, 0], [], []>} : vector<16x32xf32>, vector<16x32xf32>, vector<16x16xf32> -> vector<16x16xf32>
      %cst_30 = arith.constant 0.000000e+00 : f32
      %104 = vector.broadcast %cst_30 : f32 to vector<16x16xf32>
      %105 = arith.select %10, %103, %104 : vector<16x16xi1>, vector<16x16xf32>
      %cst_31 = arith.constant dense<0.000000e+00> : vector<16xf32>
      %106 = vector.multi_reduction <add>, %105, %cst_31 [1] : vector<16x16xf32> to vector<16xf32>
      %107 = vector.shape_cast %106 : vector<16xf32> to vector<16x1xf32>
      %108 = vector.shape_cast %106 : vector<16xf32> to vector<1x16xf32>
      %109 = vector.broadcast %107 : vector<16x1xf32> to vector<16x16xf32>
      %110 = vector.broadcast %108 : vector<1x16xf32> to vector<16x16xf32>
      %111 = arith.addf %109, %110 : vector<16x16xf32>
      %cst_32 = arith.constant 2.000000e+00 : f32
      %112 = vector.broadcast %cst_32 : f32 to vector<16x16xf32>
      %113 = arith.mulf %112, %103 : vector<16x16xf32>
      %114 = arith.subf %111, %113 : vector<16x16xf32>
      %cst_33 = arith.constant 9.99999996E-13 : f32
      %115 = vector.broadcast %cst_33 : f32 to vector<16x16xf32>
      %116 = arith.maximumf %114, %115 : vector<16x16xf32>
      %117 = math.sqrt %116 : vector<16x16xf32>
      %cst_34 = arith.constant 0.000000e+00 : f32
      %118 = vector.broadcast %cst_34 : f32 to vector<16x16xf32>
      %119 = arith.select %10, %118, %117 : vector<16x16xi1>, vector<16x16xf32>
      %cst_35 = arith.constant 0.000000e+00 : f32
      %120 = vector.broadcast %cst_35 : f32 to vector<16x16xf32>
      %121 = arith.cmpf ogt, %119, %120 : vector<16x16xf32>
      %cst_36 = arith.constant 0.000000e+00 : f32
      %122 = vector.broadcast %cst_36 : f32 to vector<16x16xf32>
      %123 = arith.select %121, %119, %122 : vector<16x16xi1>, vector<16x16xf32>
      %124 = vector.shape_cast %123 : vector<16x16xf32> to vector<1x16x16xf32>
      %cst_37 = arith.constant dense<0.000000e+00> : vector<1xf32>
      %125 = vector.multi_reduction <add>, %124, %cst_37 [1, 2] : vector<1x16x16xf32> to vector<1xf32>
      %126 = vector.shape_cast %125 : vector<1xf32> to vector<1x1x1xf32>
      %127 = vector.extract %126[0, 0, 0] : f32 from vector<1x1x1xf32>
      %128 = arith.extui %121 : vector<16x16xi1> to vector<16x16xi32>
      %129 = arith.sitofp %128 : vector<16x16xi32> to vector<16x16xf32>
      %130 = vector.shape_cast %129 : vector<16x16xf32> to vector<1x16x16xf32>
      %cst_38 = arith.constant dense<0.000000e+00> : vector<1xf32>
      %131 = vector.multi_reduction <add>, %130, %cst_38 [1, 2] : vector<1x16x16xf32> to vector<1xf32>
      %132 = vector.shape_cast %131 : vector<1xf32> to vector<1x1x1xf32>
      %133 = vector.extract %132[0, 0, 0] : f32 from vector<1x1x1xf32>
      %134 = arith.divf %127, %133 : f32
      %cst_39 = arith.constant 1.000000e+00 : f32
      %135 = arith.divf %cst_39, %134 : f32
      %136 = vector.broadcast %135 : f32 to vector<16x16xf32>
      %137 = arith.mulf %119, %136 : vector<16x16xf32>
      %138 = arith.subf %102, %137 : vector<16x16xf32>
      %139 = arith.mulf %138, %138 : vector<16x16xf32>
      %140 = vector.shape_cast %139 : vector<16x16xf32> to vector<1x16x16xf32>
      %cst_40 = arith.constant dense<0.000000e+00> : vector<1xf32>
      %141 = vector.multi_reduction <add>, %140, %cst_40 [1, 2] : vector<1x16x16xf32> to vector<1xf32>
      %142 = vector.shape_cast %141 : vector<1xf32> to vector<1x1x1xf32>
      %143 = vector.extract %142[0, 0, 0] : f32 from vector<1x1x1xf32>
      %cst_41 = arith.constant 3.906250e-03 : f32
      %144 = arith.mulf %143, %cst_41 : f32
      %145 = arith.addf %61, %144 : f32
      %146 = vector.broadcast %145 : f32 to vector<1x8x128xf32>
      %c0_42 = arith.constant 0 : index
      %c0_43 = arith.constant 0 : index
      %c0_44 = arith.constant 0 : index
      %147 = vector.load %arg3[%c0_42, %c0_43, %c0_44] : memref<1x8x128xf32, #tpu.memory_space<vmem>>, vector<1x8x128xf32>
      tpu.vector_store %arg3[%c0_42, %c0_43, %c0_44], %146 {strides = array<i32>} : memref<1x8x128xf32, #tpu.memory_space<vmem>>, vector<1x8x128xf32>,
    } else {
    }
    %c0_i32_16 = arith.constant 0 : i32
    %65 = arith.cmpi ne, %arg0, %c0_i32_16 : i32
    %66 = arith.extui %65 : i1 to i32
    %c0_i32_17 = arith.constant 0 : i32
    %67 = arith.cmpi ne, %66, %c0_i32_17 : i32
    scf.if %67 {
      %68 = vector.broadcast %61 : f32 to vector<1x8x128xf32>
      %c0_18 = arith.constant 0 : index
      %c0_19 = arith.constant 0 : index
      %c0_20 = arith.constant 0 : index
      %69 = vector.load %arg3[%c0_18, %c0_19, %c0_20] : memref<1x8x128xf32, #tpu.memory_space<vmem>>, vector<1x8x128xf32>
      tpu.vector_store %arg3[%c0_18, %c0_19, %c0_20], %68 {strides = array<i32>} : memref<1x8x128xf32, #tpu.memory_space<vmem>>, vector<1x8x128xf32>,
    } else {
    }
    return
  }
  func.func @transform_0(%arg0: i32) -> (i32, i32) {
    %c0_i32 = arith.constant 0 : i32
    %c0_i32_0 = arith.constant 0 : i32
    %c0_i32_1 = arith.constant 0 : i32
    return %c0_i32, %c0_i32_0 : i32, i32
  }
  func.func @transform_1(%arg0: i32) -> (i32, i32) {
    %c0_i32 = arith.constant 0 : i32
    %c0_i32_0 = arith.constant 0 : i32
    %c0_i32_1 = arith.constant 0 : i32
    return %c0_i32, %c0_i32_0 : i32, i32
  }
  func.func @transform_2(%arg0: i32) -> (i32, i32, i32) {
    %c0_i32 = arith.constant 0 : i32
    %c0_i32_0 = arith.constant 0 : i32
    %c0_i32_1 = arith.constant 0 : i32
    return %arg0, %c0_i32, %c0_i32_0 : i32, i32, i32
  }
}

</mosaic_0001>

<bundles_post_ra>
// kernel: tpu_custom_call.1
= control target key start
LH: loop header
LB: loop body
LE: loop exit
PB: predicated region body
PF: predicated region fallthrough
CT: control target
= control target key end

     0   :  { %7 = vsyncpa [#allocation3], 0  ;;  %s4338_s0 = inlined_call_operand.hbm [shape: f32[16,32], index: 0, kind: input, shape index: {}]   ;;  %s4339_s1 = inlined_call_operand.hbm [shape: f32[16,32], index: 1, kind: input, shape index: {}]   ;;  %s4340_s2 = inlined_call_operand.hbm [shape: f32[2,8,128], index: 2, kind: output, shape index: {}]  }
   0x1   :  { %8 = vsyncpa [#allocation6], 0 }
   0x2   :  { %9 = vsyncpa [#allocation4], 0 }
   0x3   :  { %11 = vsyncpa [#allocation4 + $0x1], 0  ;;  %s3499_s9 = smov 0   ;;  %s3501_s10 = smov 0  }
   0x4   :  { %s3503_s11 = smov 0   ;;  %s3505_s12 = smov 0  }
   0x5 LB: > { %s3520_s13 = sadd.s32 4294967295, %s3475_s12   ;;  %s2786_s14 = sadd.s32 4294967294, %s3475_s12   ;;  %s3475_s12 = sphi %s3505_s12, %s4382_s12   ;;  %s3471_s11 = sphi %s3503_s11, %s4381_s11   ;;  %s3467_s10 = sphi %s3501_s10, %s4380_s10   ;;  %s3463_s9 = sphi %s3499_s9, %s4379_s9  }
   0x6   : > { %s3524_s15 = sadd.s32 1, %s3475_s12   ;;  %s66_s16 = sadd.s32 1, %s3471_s11 }
   0x7   : > { %s63_s17 = ssub.s32 %s3475_s12, %s3524_s15  ;;  %p76_p0 = scmp.ne.s32.totalorder %s3471_s11, %s3467_s10 }
   0x8   : > { %p64_p1 = scmp.eq.s32.totalorder %s63_s17, 0  ;;  %p77_p2 = scmp.eq.s32.totalorder %s3520_s13, 1 }
   0x9   : > { %p82_p3 = scmp.ne.s32.totalorder %s3467_s10, %s3463_s9  ;;  %p83_p4 = scmp.eq.s32.totalorder %s2786_s14, 1 }
   0xa   : > { %s3535_s18 = scalar_select %p64_p1, %s3471_s11, %s66_s16  }
   0xb   : > { %p3537_p5 = por %p77_p2, %p76_p0  ;;  %p3541_p6 = por %p83_p4, %p82_p3 }
   0xc   : > { %p2787_p7 = scmp.ge.s32.totalorder %s3475_s12, 1  ;;  %p90_p8 = scmp.lt.s32.totalorder %s3475_s12, 3 }
   0xd   : > { %s4352_s19 = scalar_select %p3537_p5, 1, 0 }
   0xe   : > { %s4353_s20 = scalar_select %p3541_p6, 1, 0 }
   0xf   : > { %p4341_p10 = scmp.eq.s32.totalorder %s3520_s13, 0  ;;  %p3549_p11 = pnand %p2787_p7, %p90_p8 }
  0x10   : > { %s3477_s22 = smov [#allocation2]   ;;  %s3478_s25 = smov [#allocation5]  }
  0x11   : > { %s4354_s21 = scalar_select %p3549_p11, 1, 0 }
  0x12   : > { %s102_s23 = sshll.u32 %s3477_s22, 4  ;;  %p3213_p12 = pneg %p3549_p11  ;;  %s103_s23 = int_to_ptr.vmem [resolvable:$true] %s102_s23 }
  0x13   : > { %s115_s26 = sshll.u32 %s3478_s25, 4  ;;  %s3349_s29 = scalar_lea.hbm %s4338_s0, 256  ;;  %s3561_s26 = int_to_ptr.vmem [resolvable:$true] %s115_s26 }
  0x14   : > { %p3557_p13 = pnand %p4341_p10, %p3213_p12  ;;  %p3350_p0 = scmp.ne.s32.totalorder %s4338_s0, %s3349_s29 }
  0x15   : > { %p3356_p4 = scmp.lt.u32.totalorder %s3349_s29, %s4338_s0 }
  0x16   : > { %p3351_p1 = pneg %p3557_p13 }
  0x18   : > { %p3352_p2 = pnand %p3351_p1, %p3350_p0 }
  0x1a   : > { %p3353_p3 = pneg %p3352_p2 }
  0x1c   : > { %p3358_p7 = pnand %p3356_p4, %p3353_p3 }
  0x1e   : > { %3361 = shalt.err (!%p3358_p7)
}
  0x1f   : > { %s3362_s6 = scalar_lea.vmem %s103_s23, 256  ;;  %p3370_p10 = scmp.lt.s32.totalorder %s103_s23, %s103_s23 }
  0x20   : > { %p3363_p8 = scmp.ne.s32.totalorder %s103_s23, %s3362_s6  ;;  %p3371_p6 = scmp.lt.s32.totalorder %s3362_s6, %s3362_s6 }
  0x22   : > { %p3365_p12 = pnand %p3363_p8, %p3351_p1  ;;  %p3372_p5 = por %p3371_p6, %p3370_p10 }
  0x24   : > { %p3366_p9 = pneg %p3365_p12 }
  0x26   : > { %p3373_p11 = pnand %p3372_p5, %p3366_p9 }
  0x28   : > { %3376 = shalt.err (!%p3373_p11)
}
  0x29   : > { %s3479_s7 = smov 128   ;;  %s3480_s8 = smov 8  }
  0x2a   : > { %3216 = dma.hbm_to_vmem [thread:$0]  (!%p3557_p13), %s4338_s0, 256, %s103_s23, [#allocation3], %s3479_s7, %s3479_s7, %s3480_s8  }
  0x2b   : > { %s3377_s25 = scalar_lea.hbm %s4339_s1, 256 }
  0x2c   : > { %p3378_p0 = scmp.ne.s32.totalorder %s4339_s1, %s3377_s25  ;;  %p3384_p9 = scmp.lt.u32.totalorder %s3377_s25, %s4339_s1 }
  0x2e   : > { %p3380_p5 = pnand %p3378_p0, %p3351_p1 }
  0x30   : > { %p3381_p6 = pneg %p3380_p5 }
  0x32   : > { %p3386_p10 = pnand %p3384_p9, %p3381_p6 }
  0x34   : > { %3389 = shalt.err (!%p3386_p10)
}
  0x35   : > { %s3390_s23 = scalar_lea.vmem %s3561_s26, 256  ;;  %p3398_p4 = scmp.lt.s32.totalorder %s3561_s26, %s3561_s26 }
  0x36   : > { %p3391_p11 = scmp.ne.s32.totalorder %s3561_s26, %s3390_s23  ;;  %p3399_p7 = scmp.lt.s32.totalorder %s3390_s23, %s3390_s23 }
  0x38   : > { %p3393_p2 = pnand %p3391_p11, %p3351_p1  ;;  %p3400_p8 = por %p3399_p7, %p3398_p4 }
  0x3a   : > { %p3394_p3 = pneg %p3393_p2 }
  0x3c   : > { %p3401_p12 = pnand %p3400_p8, %p3394_p3 }
  0x3e   : > { %3404 = shalt.err (!%p3401_p12)
}
  0x3f   : > { %3219 = dma.hbm_to_vmem [thread:$0]  (!%p3557_p13), %s4339_s1, 256, %s3561_s26, [#allocation6], %s3479_s7, %s3479_s7, %s3480_s8  }
  0x40   : > { %p4356_p0 = scmp.ne.s32.totalorder %s4354_s21, 0 }
  0x42   : > { %131 = sbr.rel (%p4356_p0) target bundleno = 1713 (0x6b1), region = 28 }
  0x49   : > { %p4357_p5 = scmp.eq.s32.totalorder %s3520_s13, 0 }
  0x4b   : > { %3450 = dma.done.wait (%p4357_p5), [#allocation3], 256   ;;  %p4358_p1 = pmov %p4357_p5 }
  0x4d   : > { %3452 = vsyncadd (%p4358_p1), [#allocation3], 4294967040  ;;  %p4359_p6 = pmov %p4358_p1 }
  0x4e   : > { %p4360_p9 = pmov %p4358_p1 }
  0x4f   : > { %3454 = dma.done.wait (%p4359_p6), [#allocation6], 256  }
  0x50   : > { %3456 = vsyncadd (%p4360_p9), [#allocation6], 4294967040  ;;  %s149_s24 = sand.u32 1, %s3467_s10   ;;  %v161_v0 = vlaneseq  ;;  %s2794_s26 = sshll.u32 %s3520_s13, 3  ;;  %v3481_v1 = vmov 1966171168  }
  0x51   : > { %s3623_s21 = sshll.u32 %s149_s24, 3  ;;  %v171_v2 = vunpack.c.l.s4 %v3481_v1  ;;  %s157_s5 = scalar_lea.vmem [#allocation2], %s2794_s26  ;;  %v3638_v13 = vld [vmem:[#allocation2] sm:$0xff]  ;;  %v3640_v14 = vld [vmem:[#allocation2 + $0x8] sm:$0xff]  ;;  %vm274_vm0 = vcmask 261120   ;;  %v4361_v25 = vmov 0 }
  0x52   : > { %v3627_v3 = vshrl.u32 %v161_v0, 7  ;;  %v158_v6 = vld [vmem:[%s157_s5] sm:$0xff]  ;;  %s159_s6 = scalar_lea.vmem [#allocation5], %s2794_s26  ;;  %vm3652_vm1 = vmpackc.low %vm274_vm0, %vm274_vm0  ;;  %v3704_v58 = vld [vmem:[#allocation5] sm:$0xff]  ;;  %vm943_vm3 = vcmask 130048   ;;  %vm1065_vm5 = vcmask 130112  }
  0x53   : > { %v172_v4 = vunpack.c.0.s8 %v171_v2  ;;  %v169_v7 = vcombine.high %v158_v6, %v158_v6  ;;  %v3645_v20 = vld [vmem:[%s159_s6] sm:$0xff]  ;;  %v4362_v25 = vsel %vm3652_vm1, 4294967295, %v4361_v25  ;;  %v3706_v59 = vld [vmem:[#allocation5 + $0x8] sm:$0xff]  ;;  %s4200_s14 = scalar_lea.vmem [#allocation7], %s3623_s21  ;;  %p4371_p13 = scmp.ne.s32.totalorder %s3520_s13, 0 }
  0x54   : > { %v3634_v9 = vsub.s32 0, %v3627_v3  ;;  %4363 = vst [vmem:[#allocation11_spill] sm:$0xff] %v4362_v25  ;;  %4364 = vst [vmem:[#allocation12_spill] sm:$0xff] %v3706_v59  ;;  %v1209_v63 = vcombine.high %v3645_v20, %v3645_v20 }
  0x55   : > { %v3630_v5 = vsub.s32 %v172_v4, %v3627_v3 }
  0x57   : > { %v176_v8 = vrot.slane %v158_v6, %v3630_v5  ;;  %v183_v10 = vrot.slane %v169_v7, %v3630_v5  ;;  %v1216_v33 = vrot.slane %v3645_v20, %v3630_v5 }
  0x59   : > { %v192_v11 = vrot.slane %v176_v8, %v3630_v5  ;;  %v184_v12 = vcombine.high %v176_v8, %v176_v8  ;;  %v199_v18 = vrot.slane %v183_v10, %v3630_v5  ;;  %v185_v19 = vcombine.high %v183_v10, %v183_v10 }
  0x5a   : > { %v1224_v48 = vcombine.high %v1216_v33, %v1216_v33  ;;  %v1232_v51 = vrot.slane %v1216_v33, %v3630_v5 }
  0x5b   : > { %v214_v15 = vcombine.high %v192_v11, %v192_v11  ;;  %v221_v16 = vrot.slane %v192_v11, %v3634_v9  ;;  %v206_v17 = vrot.slane %v184_v12, %v3630_v5  ;;  %v237_v27 = vrot.slane %v199_v18, %v3634_v9 }
  0x5c   : > { %v213_v28 = vrot.slane %v185_v19, %v3630_v5  ;;  %v215_v44 = vcombine.high %v199_v18, %v199_v18  ;;  %v1246_v54 = vrot.slane %v1224_v48, %v3630_v5  ;;  %v1261_v57 = vrot.slane %v1232_v51, %v3634_v9 }
  0x5d   : > { %v258_v21 = vsub.f32 %v3638_v13, %v221_v16  ;;  %v259_v22 = vsub.f32 %v3640_v14, %v221_v16  ;;  %v216_v23 = vcombine.high %v206_v17, %v206_v17  ;;  %v225_v24 = vrot.slane %v206_v17, %v3634_v9 }
  0x5e   : > { %v229_v26 = vrot.slane %v214_v15, %v3634_v9  ;;  %v241_v40 = vrot.slane %v213_v28, %v3634_v9  ;;  %v266_v42 = vsub.f32 %v3638_v13, %v237_v27  ;;  %v267_v43 = vsub.f32 %v3640_v14, %v237_v27 }
  0x5f   : > { %v3075_v29 = vpack.c.bf16 %v259_v22, %v258_v21  ;;  %v260_v30 = vsub.f32 %v3638_v13, %v225_v24  ;;  %v261_v31 = vsub.f32 %v3640_v14, %v225_v24  ;;  %2953 = vmatprep.mubr.msk.f32.mxu0 %vm274_vm0, %v258_v21  ;;  %v233_v32 = vrot.slane %v216_v23, %v3634_v9 }
  0x60   : > { %v262_v34 = vsub.f32 %v3638_v13, %v229_v26  ;;  %v263_v35 = vsub.f32 %v3640_v14, %v229_v26  ;;  %v268_v45 = vsub.f32 %v3638_v13, %v241_v40  ;;  %v269_v46 = vsub.f32 %v3640_v14, %v241_v40 }
  0x61   : > { %3077 = vmatprep.subr.msk.bf16.mxu0 %vm3652_vm1, %v3075_v29  ;;  %v3081_v36 = vpack.c.bf16 %v261_v31, %v260_v30  ;;  %2960 = vmatprep.mubr.msk.f32.mxu1 %vm274_vm0, %v260_v30  ;;  %v264_v37 = vsub.f32 %v3638_v13, %v233_v32  ;;  %v265_v38 = vsub.f32 %v3640_v14, %v233_v32 }
  0x62   : > { %3080 = vmatpush3.bf16.xpose.msk.msra.mxu0 %vm3652_vm1, %v3075_v29  ;;  %v3087_v39 = vpack.c.bf16 %v263_v35, %v262_v34  ;;  %v217_v47 = vcombine.high %v213_v28, %v213_v28  ;;  %v3099_v49 = vpack.c.bf16 %v267_v43, %v266_v42  ;;  %v245_v50 = vrot.slane %v215_v44, %v3634_v9 }
  0x63   : > { %3083 = vmatprep.subr.msk.bf16.mxu1 %vm3652_vm1, %v3081_v36  ;;  %v3093_v41 = vpack.c.bf16 %v265_v38, %v264_v37  ;;  %v3105_v52 = vpack.c.bf16 %v269_v46, %v268_v45  ;;  %v1265_v62 = vrot.slane %v1246_v54, %v3634_v9  ;;  %v1298_v2 = vsub.f32 %v3704_v58, %v1261_v57 }
  0x64   : > { %3086 = vmatpush3.bf16.xpose.msk.msra.mxu1 %vm3652_vm1, %v3081_v36  ;;  %3089 = vmatprep.subr.msk.bf16.mxu0 %vm3652_vm1, %v3087_v39  ;;  %v249_v53 = vrot.slane %v217_v47, %v3634_v9  ;;  %v270_v55 = vsub.f32 %v3638_v13, %v245_v50  ;;  %v271_v56 = vsub.f32 %v3640_v14, %v245_v50 }
  0x65   : > { %3095 = vmatprep.subr.msk.bf16.mxu1 %vm3652_vm1, %v3093_v41  ;;  %v1299_v4 = vsub.f32 %v3706_v59, %v1261_v57  ;;  %v1254_v6 = vcombine.high %v1232_v51, %v1232_v51  ;;  %v1300_v8 = vsub.f32 %v3704_v58, %v1265_v62  ;;  %v1301_v10 = vsub.f32 %v3706_v59, %v1265_v62 }
  0x66   : > { %v272_v60 = vsub.f32 %v3638_v13, %v249_v53  ;;  %v273_v61 = vsub.f32 %v3640_v14, %v249_v53  ;;  %v3111_v1 = vpack.c.bf16 %v271_v56, %v270_v55  ;;  %v1256_v11 = vcombine.high %v1246_v54, %v1246_v54 }
  0x67   : > { %v1314_v12 = vadd.f32 1e-06, %v1298_v2  ;;  %v1315_v15 = vadd.f32 1e-06, %v1299_v4  ;;  %v1269_v16 = vrot.slane %v1254_v6, %v3634_v9  ;;  %v1223_v17 = vrot.slane %v1209_v63, %v3630_v5 }
  0x68   : > { %v3117_v7 = vpack.c.bf16 %v273_v61, %v272_v60  ;;  %v1316_v18 = vadd.f32 1e-06, %v1300_v8  ;;  %v1317_v19 = vadd.f32 1e-06, %v1301_v10  ;;  %v1273_v20 = vrot.slane %v1256_v11, %v3634_v9 }
  0x69   : > { %2954 = vmatmul.mubr.msk.f32.vlgmr.msra.gmra.mrb[0].mxu0 %vm274_vm0, %v259_v22  ;;  %v1225_v21 = vcombine.high %v1223_v17, %v1223_v17  ;;  %v3123_v22 = vpack.c.bf16 %v1315_v15, %v1314_v12  ;;  %v1302_v23 = vsub.f32 %v3704_v58, %v1269_v16  ;;  %v1303_v24 = vsub.f32 %v3706_v59, %v1269_v16 }
  0x6a   : > { %3092 = vmatpush3.bf16.xpose.msk.msra.mxu0 %vm3652_vm1, %v3087_v39  ;;  %2967 = vmatprep.mubr.msk.f32.mxu0 %vm274_vm0, %v262_v34  ;;  %v1239_v26 = vrot.slane %v1223_v17, %v3630_v5  ;;  %v3129_v27 = vpack.c.bf16 %v1317_v19, %v1316_v18  ;;  %v1304_v28 = vsub.f32 %v3704_v58, %v1273_v20  ;;  %v163_v63 = vadd.s32 8, %v3627_v3 }
  0x6b   : > { %2961 = vmatmul.mubr.msk.f32.vlgmr.msra.gmra.mrb[0].mxu1 %vm274_vm0, %v261_v31  ;;  %3101 = vmatprep.subr.msk.bf16.mxu0 %vm3652_vm1, %v3099_v49  ;;  %v1305_v29 = vsub.f32 %v3706_v59, %v1273_v20  ;;  %v1253_v30 = vrot.slane %v1225_v21, %v3630_v5  ;;  %v1318_v31 = vadd.f32 1e-06, %v1302_v23  ;;  %v1319_v32 = vadd.f32 1e-06, %v1303_v24 }
  0x6c   : > { %3098 = vmatpush3.bf16.xpose.msk.msra.mxu1 %vm3652_vm1, %v3093_v41  ;;  %2974 = vmatprep.mubr.msk.f32.mxu1 %vm274_vm0, %v264_v37  ;;  %v1277_v33 = vrot.slane %v1239_v26, %v3634_v9  ;;  %v1320_v5 = vadd.f32 1e-06, %v1304_v28  ;;  %v1255_v39 = vcombine.high %v1239_v26, %v1239_v26  ;;  %v4365_v2 = vmov 0 }
  0x6d   : > { %3107 = vmatprep.subr.msk.bf16.mxu1 %vm3652_vm1, %v3105_v52  ;;  %v1321_v34 = vadd.f32 1e-06, %v1305_v29  ;;  %v3135_v36 = vpack.c.bf16 %v1319_v32, %v1318_v31  ;;  %v4368_v6 = vmov 0 }
  0x6e   : > { %v1306_v37 = vsub.f32 %v3704_v58, %v1277_v33 }
  0x6f   : > { %v3141_v40 = vpack.c.bf16 %v1321_v34, %v1320_v5 }
  0x70   : > { %v1322_v44 = vadd.f32 1e-06, %v1306_v37 }
  0x71   : > { %2968 = vmatmul.mubr.msk.f32.vlgmr.msra.gmra.mrb[2].mxu0 %vm274_vm0, %v263_v35  ;;  %v1281_v35 = vrot.slane %v1253_v30, %v3634_v9 }
  0x72   : > { %3104 = vmatpush3.bf16.xpose.msk.msra.mxu0 %vm3652_vm1, %v3099_v49  ;;  %2981 = vmatprep.mubr.msk.f32.mxu0 %vm274_vm0, %v266_v42 }
  0x73   : > { %2975 = vmatmul.mubr.msk.f32.vlgmr.msra.gmra.mrb[2].mxu1 %vm274_vm0, %v265_v38  ;;  %3113 = vmatprep.subr.msk.bf16.mxu0 %vm3652_vm1, %v3111_v1  ;;  %v1307_v38 = vsub.f32 %v3706_v59, %v1277_v33  ;;  %v1308_v41 = vsub.f32 %v3704_v58, %v1281_v35  ;;  %v1309_v42 = vsub.f32 %v3706_v59, %v1281_v35 }
  0x74   : > { %3110 = vmatpush3.bf16.xpose.msk.msra.mxu1 %vm3652_vm1, %v3105_v52  ;;  %2988 = vmatprep.mubr.msk.f32.mxu1 %vm274_vm0, %v268_v45 }
  0x75   : > { %3119 = vmatprep.subr.msk.bf16.mxu1 %vm3652_vm1, %v3117_v7  ;;  %v1323_v45 = vadd.f32 1e-06, %v1307_v38  ;;  %v1324_v47 = vadd.f32 1e-06, %v1308_v41  ;;  %v1325_v48 = vadd.f32 1e-06, %v1309_v42 }
  0x77   : > { %v3147_v50 = vpack.c.bf16 %v1323_v45, %v1322_v44  ;;  %v3153_v53 = vpack.c.bf16 %v1325_v48, %v1324_v47 }
  0x79   : > { %2982 = vmatmul.mubr.msk.f32.vlgmr.msra.gmra.mrb[4].mxu0 %vm274_vm0, %v267_v43  ;;  %v1257_v43 = vcombine.high %v1253_v30, %v1253_v30 }
  0x7a   : > { %3116 = vmatpush3.bf16.xpose.msk.msra.mxu0 %vm3652_vm1, %v3111_v1  ;;  %2995 = vmatprep.mubr.msk.f32.mxu0 %vm274_vm0, %v270_v55  ;;  %v3812_v1 = vand.u32 127, %v161_v0 }
  0x7b   : > { %2989 = vmatmul.mubr.msk.f32.vlgmr.msra.gmra.mrb[4].mxu1 %vm274_vm0, %v269_v46  ;;  %3125 = vmatprep.subr.msk.bf16.mxu0 %vm3652_vm1, %v3123_v22  ;;  %v1285_v46 = vrot.slane %v1255_v39, %v3634_v9  ;;  %v1289_v49 = vrot.slane %v1257_v43, %v3634_v9 }
  0x7c   : > { %3122 = vmatpush3.bf16.xpose.msk.msra.mxu1 %vm3652_vm1, %v3117_v7  ;;  %3002 = vmatprep.mubr.msk.f32.mxu1 %vm274_vm0, %v272_v60  ;;  %vm3815_vm2 = vcmp.eq.s32.totalorder %v163_v63, %v3812_v1  ;;  %vm3823_vm4 = vcmp.eq.s32.totalorder %v3627_v3, %v3812_v1 }
  0x7d   : > { %3131 = vmatprep.subr.msk.bf16.mxu1 %vm3652_vm1, %v3129_v27  ;;  %v1310_v51 = vsub.f32 %v3704_v58, %v1285_v46  ;;  %v1311_v52 = vsub.f32 %v3706_v59, %v1285_v46  ;;  %v1312_v54 = vsub.f32 %v3704_v58, %v1289_v49  ;;  %v1313_v55 = vsub.f32 %v3706_v59, %v1289_v49 }
  0x7e   : > { %v4366_v2 = vsel %vm3815_vm2, 4294967295, %v4365_v2  ;;  %v4369_v6 = vsel %vm3823_vm4, 4294967295, %v4368_v6 }
  0x7f   : > { %v1326_v9 = vadd.f32 1e-06, %v1310_v51  ;;  %v1328_v57 = vadd.f32 1e-06, %v1312_v54  ;;  %v1329_v60 = vadd.f32 1e-06, %v1313_v55 }
  0x80   : > { %4367 = vst [vmem:[#allocation13_spill] sm:$0xff] %v4366_v2  ;;  %4370 = vst [vmem:[#allocation14_spill] sm:$0xff] %v4369_v6 }
  0x81   : > { %2996 = vmatmul.mubr.msk.f32.vlgmr.msra.gmra.mrb[6].mxu0 %vm274_vm0, %v271_v56  ;;  %v1327_v56 = vadd.f32 1e-06, %v1311_v52  ;;  %v3165_v62 = vpack.c.bf16 %v1329_v60, %v1328_v57 }
  0x82   : > { %3128 = vmatpush3.bf16.xpose.msk.msra.mxu0 %vm3652_vm1, %v3123_v22  ;;  %3009 = vmatprep.mubr.msk.f32.mxu0 %vm274_vm0, %v1314_v12 }
  0x83   : > { %3003 = vmatmul.mubr.msk.f32.vlgmr.msra.gmra.mrb[6].mxu1 %vm274_vm0, %v273_v61  ;;  %3137 = vmatprep.subr.msk.bf16.mxu0 %vm3652_vm1, %v3135_v36  ;;  %v3159_v61 = vpack.c.bf16 %v1327_v56, %v1326_v9 }
  0x84   : > { %3134 = vmatpush3.bf16.xpose.msk.msra.mxu1 %vm3652_vm1, %v3129_v27  ;;  %3016 = vmatprep.mubr.msk.f32.mxu1 %vm274_vm0, %v1316_v18 }
  0x85   : > { %3143 = vmatprep.subr.msk.bf16.mxu1 %vm3652_vm1, %v3141_v40 }
  0x89   : > { %3010 = vmatmul.mubr.msk.f32.vlgmr.msra.gmra.mrb[8].mxu0 %vm274_vm0, %v1315_v15 }
  0x8a   : > { %3140 = vmatpush3.bf16.xpose.msk.msra.mxu0 %vm3652_vm1, %v3135_v36  ;;  %3023 = vmatprep.mubr.msk.f32.mxu0 %vm274_vm0, %v1318_v31 }
  0x8b   : > { %3017 = vmatmul.mubr.msk.f32.vlgmr.msra.gmra.mrb[8].mxu1 %vm274_vm0, %v1317_v19  ;;  %3149 = vmatprep.subr.msk.bf16.mxu0 %vm3652_vm1, %v3147_v50 }
  0x8c   : > { %3146 = vmatpush3.bf16.xpose.msk.msra.mxu1 %vm3652_vm1, %v3141_v40  ;;  %3030 = vmatprep.mubr.msk.f32.mxu1 %vm274_vm0, %v1320_v5 }
  0x8d   : > { %3155 = vmatprep.subr.msk.bf16.mxu1 %vm3652_vm1, %v3153_v53 }
  0x91   : > { %3024 = vmatmul.mubr.msk.f32.vlgmr.msra.gmra.mrb[10].mxu0 %vm274_vm0, %v1319_v32 }
  0x92   : > { %3152 = vmatpush3.bf16.xpose.msk.msra.mxu0 %vm3652_vm1, %v3147_v50  ;;  %3037 = vmatprep.mubr.msk.f32.mxu0 %vm274_vm0, %v1322_v44 }
  0x93   : > { %3031 = vmatmul.mubr.msk.f32.vlgmr.msra.gmra.mrb[10].mxu1 %vm274_vm0, %v1321_v34  ;;  %3161 = vmatprep.subr.msk.bf16.mxu0 %vm3652_vm1, %v3159_v61 }
  0x94   : > { %3158 = vmatpush3.bf16.xpose.msk.msra.mxu1 %vm3652_vm1, %v3153_v53  ;;  %3044 = vmatprep.mubr.msk.f32.mxu1 %vm274_vm0, %v1324_v47 }
  0x95   : > { %3167 = vmatprep.subr.msk.bf16.mxu1 %vm3652_vm1, %v3165_v62 }
  0x99   : > { %3038 = vmatmul.mubr.msk.f32.vlgmr.msra.gmra.mrb[12].mxu0 %vm274_vm0, %v1323_v45 }
  0x9a   : > { %3164 = vmatpush3.bf16.xpose.msk.msra.mxu0 %vm3652_vm1, %v3159_v61  ;;  %3051 = vmatprep.mubr.msk.f32.mxu0 %vm274_vm0, %v1326_v9 }
  0x9b   : > { %3045 = vmatmul.mubr.msk.f32.vlgmr.msra.gmra.mrb[12].mxu1 %vm274_vm0, %v1325_v48 }
  0x9c   : > { %3170 = vmatpush3.bf16.xpose.msk.msra.mxu1 %vm3652_vm1, %v3165_v62  ;;  %3058 = vmatprep.mubr.msk.f32.mxu1 %vm274_vm0, %v1328_v57 }
  0xa1   : > { %3052 = vmatmul.mubr.msk.f32.vlgmr.msra.gmra.mrb[14].mxu0 %vm274_vm0, %v1327_v56 }
  0xa2   : > { %3065 = vmatprep.mubr.msk.f32.mxu0 (!%p4371_p13), %vm274_vm0, %v3638_v13 }
  0xa3   : > { %3059 = vmatmul.mubr.msk.f32.vlgmr.msra.gmra.mrb[14].mxu1 %vm274_vm0, %v1329_v60 }
  0xa4   : > { %3072 = vmatprep.mubr.msk.f32.mxu1 (!%p4371_p13), %vm274_vm0, %v3704_v58 }
 0x13c   : > { %v3819_v4 = vpop.f32.mrb[0].mxu0 }
 0x13d   : > { %v3827_v7 = vpop.f32.mrb[1].mxu0  ;;  %v928_v0 = vsel %vm3815_vm2, %v3819_v4, 0.0 }
 0x13e   : > { %v3832_v8 = vpop.f32.mrb[0].mxu1  ;;  %v947_v10 = vsel %vm943_vm3, %v928_v0, 0.0  ;;  %v927_v15 = vsel %vm3823_vm4, %v3827_v7, 0.0 }
 0x13f   : > { %948 = vadd.xlane.f32.xlu0 %v947_v10  ;;  %v3835_v11 = vpop.f32.mrb[1].mxu1  ;;  %v930_v12 = vsel %vm3815_vm2, %v3832_v8, 0.0  ;;  %v944_v17 = vsel %vm943_vm3, %v927_v15, 0.0 }
 0x140   : > { %v953_v16 = vsel %vm943_vm3, %v930_v12, 0.0  ;;  %v929_v18 = vsel %vm3823_vm4, %v3835_v11, 0.0 }
 0x141   : > { %954 = vadd.xlane.f32.xlu1 %v953_v16  ;;  %v950_v23 = vsel %vm943_vm3, %v929_v18, 0.0 }
 0x143   : > { %945 = vadd.xlane.f32.xlu0 %v944_v17 }
 0x144   : > { %v3848_v19 = vpop.f32.mrb[2].mxu0 }
 0x145   : > { %v3850_v20 = vpop.f32.mrb[3].mxu0  ;;  %v932_v21 = vsel %vm3815_vm2, %v3848_v19, 0.0 }
 0x146   : > { %v3855_v22 = vpop.f32.mrb[2].mxu1  ;;  %v959_v24 = vsel %vm943_vm3, %v932_v21, 0.0  ;;  %v931_v28 = vsel %vm3823_vm4, %v3850_v20, 0.0 }
 0x147   : > { %951 = vadd.xlane.f32.xlu0 %v950_v23  ;;  %960 = vadd.xlane.f32.xlu1 %v959_v24  ;;  %v3859_v26 = vpop.f32.mrb[3].mxu1  ;;  %v934_v27 = vsel %vm3815_vm2, %v3855_v22, 0.0  ;;  %v956_v30 = vsel %vm943_vm3, %v931_v28, 0.0 }
 0x148   : > { %v965_v29 = vsel %vm943_vm3, %v934_v27, 0.0  ;;  %v933_v31 = vsel %vm3823_vm4, %v3859_v26, 0.0 }
 0x149   : > { %v962_v35 = vsel %vm943_vm3, %v933_v31, 0.0 }
 0x14b   : > { %966 = vadd.xlane.f32.xlu1 %v965_v29  ;;  %957 = vadd.xlane.f32.xlu0 %v956_v30 }
 0x14c   : > { %v3872_v32 = vpop.f32.mrb[4].mxu0 }
 0x14d   : > { %v3874_v33 = vpop.f32.mrb[5].mxu0  ;;  %v936_v5 = vsel %vm3815_vm2, %v3872_v32, 0.0 }
 0x14e   : > { %v3879_v34 = vpop.f32.mrb[4].mxu1  ;;  %v971_v36 = vsel %vm943_vm3, %v936_v5, 0.0  ;;  %v935_v39 = vsel %vm3823_vm4, %v3874_v33, 0.0 }
 0x14f   : > { %963 = vadd.xlane.f32.xlu0 %v962_v35  ;;  %972 = vadd.xlane.f32.xlu1 %v971_v36  ;;  %v3883_v37 = vpop.f32.mrb[5].mxu1  ;;  %v938_v38 = vsel %vm3815_vm2, %v3879_v34, 0.0  ;;  %v968_v41 = vsel %vm943_vm3, %v935_v39, 0.0 }
 0x150   : > { %v977_v40 = vsel %vm943_vm3, %v938_v38, 0.0  ;;  %v937_v42 = vsel %vm3823_vm4, %v3883_v37, 0.0 }
 0x151   : > { %v974_v47 = vsel %vm943_vm3, %v937_v42, 0.0 }
 0x153   : > { %978 = vadd.xlane.f32.xlu1 %v977_v40  ;;  %969 = vadd.xlane.f32.xlu0 %v968_v41 }
 0x154   : > { %v3896_v43 = vpop.f32.mrb[6].mxu0 }
 0x155   : > { %v3898_v44 = vpop.f32.mrb[7].mxu0  ;;  %v940_v45 = vsel %vm3815_vm2, %v3896_v43, 0.0 }
 0x156   : > { %v3903_v46 = vpop.f32.mrb[6].mxu1  ;;  %v983_v48 = vsel %vm943_vm3, %v940_v45, 0.0  ;;  %v939_v51 = vsel %vm3823_vm4, %v3898_v44, 0.0 }
 0x157   : > { %975 = vadd.xlane.f32.xlu0 %v974_v47  ;;  %984 = vadd.xlane.f32.xlu1 %v983_v48  ;;  %v3907_v49 = vpop.f32.mrb[7].mxu1  ;;  %v942_v50 = vsel %vm3815_vm2, %v3903_v46, 0.0  ;;  %v980_v53 = vsel %vm943_vm3, %v939_v51, 0.0 }
 0x158   : > { %v989_v52 = vsel %vm943_vm3, %v942_v50, 0.0  ;;  %v941_v54 = vsel %vm3823_vm4, %v3907_v49, 0.0 }
 0x159   : > { %v986_v61 = vsel %vm943_vm3, %v941_v54, 0.0 }
 0x15b   : > { %990 = vadd.xlane.f32.xlu1 %v989_v52  ;;  %981 = vadd.xlane.f32.xlu0 %v980_v53 }
 0x15c   : > { %v3920_v55 = vpop.f32.mrb[8].mxu0 }
 0x15d   : > { %v3922_v9 = vpop.f32.mrb[9].mxu0  ;;  %v1979_v56 = vsel %vm3815_vm2, %v3920_v55, 0.0 }
 0x15e   : > { %v3927_v57 = vpop.f32.mrb[8].mxu1  ;;  %v1997_v60 = vsel %vm943_vm3, %v1979_v56, 0.0  ;;  %v1978_v63 = vsel %vm3823_vm4, %v3922_v9, 0.0 }
 0x15f   : > { %1998 = vadd.xlane.f32.xlu1 %v1997_v60  ;;  %987 = vadd.xlane.f32.xlu0 %v986_v61  ;;  %v3931_v62 = vpop.f32.mrb[9].mxu1  ;;  %v1981_v12 = vsel %vm3815_vm2, %v3927_v57, 0.0  ;;  %v1994_v15 = vsel %vm943_vm3, %v1978_v63, 0.0 }
 0x160   : > { %v1980_v0 = vsel %vm3823_vm4, %v3931_v62, 0.0  ;;  %v2003_v17 = vsel %vm943_vm3, %v1981_v12, 0.0 }
 0x161   : > { %v2000_v10 = vsel %vm943_vm3, %v1980_v0, 0.0 }
 0x163   : > { %1995 = vadd.xlane.f32.xlu1 %v1994_v15  ;;  %2001 = vadd.xlane.f32.xlu0 %v2000_v10 }
 0x164   : > { %v3944_v16 = vpop.f32.mrb[10].mxu0 }
 0x165   : > { %v3947_v18 = vpop.f32.mrb[11].mxu0  ;;  %v1983_v21 = vsel %vm3815_vm2, %v3944_v16, 0.0 }
 0x166   : > { %v3952_v23 = vpop.f32.mrb[10].mxu1  ;;  %v1982_v24 = vsel %vm3823_vm4, %v3947_v18, 0.0  ;;  %v2009_v29 = vsel %vm943_vm3, %v1983_v21, 0.0 }
 0x167   : > { %2004 = vadd.xlane.f32.xlu1 %v2003_v17  ;;  %v2006_v27 = vsel %vm943_vm3, %v1982_v24, 0.0  ;;  %v3958_v28 = vpop.f32.mrb[11].mxu1  ;;  %v1985_v5 = vsel %vm3815_vm2, %v3952_v23, 0.0 }
 0x168   : > { %2007 = vadd.xlane.f32.xlu0 %v2006_v27  ;;  %v1984_v30 = vsel %vm3823_vm4, %v3958_v28, 0.0  ;;  %v2015_v36 = vsel %vm943_vm3, %v1985_v5, 0.0 }
 0x169   : > { %v2012_v31 = vsel %vm943_vm3, %v1984_v30, 0.0 }
 0x16b   : > { %2010 = vadd.xlane.f32.xlu1 %v2009_v29 }
 0x16c   : > { %v3968_v35 = vpop.f32.mrb[12].mxu0  ;;  %2013 = vadd.xlane.f32.xlu0 %v2012_v31 }
 0x16d   : > { %v3971_v38 = vpop.f32.mrb[13].mxu0  ;;  %v1987_v39 = vsel %vm3815_vm2, %v3968_v35, 0.0 }
 0x16e   : > { %v3976_v40 = vpop.f32.mrb[12].mxu1  ;;  %v1986_v41 = vsel %vm3823_vm4, %v3971_v38, 0.0  ;;  %v2021_v47 = vsel %vm943_vm3, %v1987_v39, 0.0 }
 0x16f   : > { %2016 = vadd.xlane.f32.xlu1 %v2015_v36  ;;  %v2018_v42 = vsel %vm943_vm3, %v1986_v41, 0.0  ;;  %v3982_v45 = vpop.f32.mrb[13].mxu1  ;;  %v1989_v51 = vsel %vm3815_vm2, %v3976_v40, 0.0 }
 0x170   : > { %2019 = vadd.xlane.f32.xlu0 %v2018_v42  ;;  %v1988_v48 = vsel %vm3823_vm4, %v3982_v45, 0.0  ;;  %v2027_v53 = vsel %vm943_vm3, %v1989_v51, 0.0 }
 0x171   : > { %v2024_v50 = vsel %vm943_vm3, %v1988_v48, 0.0 }
 0x173   : > { %2022 = vadd.xlane.f32.xlu1 %v2021_v47 }
 0x174   : > { %v3992_v52 = vpop.f32.mrb[14].mxu0  ;;  %2025 = vadd.xlane.f32.xlu0 %v2024_v50 }
 0x175   : > { %v3995_v54 = vpop.f32.mrb[15].mxu0  ;;  %v1991_v56 = vsel %vm3815_vm2, %v3992_v52, 0.0 }
 0x176   : > { %v1990_v60 = vsel %vm3823_vm4, %v3995_v54, 0.0  ;;  %v4003_v61 = vpop.f32.mrb[14].mxu1  ;;  %v2033_v15 = vsel %vm943_vm3, %v1991_v56, 0.0 }
 0x177   : > { %2028 = vadd.xlane.f32.xlu1 %v2027_v53  ;;  %v2030_v63 = vsel %vm943_vm3, %v1990_v60, 0.0  ;;  %v4006_v0 = vpop.f32.mrb[15].mxu1  ;;  %v1993_v10 = vsel %vm3815_vm2, %v4003_v61, 0.0 }
 0x178   : > { %2031 = vadd.xlane.f32.xlu0 %v2030_v63  ;;  %v1992_v12 = vsel %vm3823_vm4, %v4006_v0, 0.0  ;;  %v2039_v21 = vsel %vm943_vm3, %v1993_v10, 0.0 }
 0x179   : > { %v2036_v17 = vsel %vm943_vm3, %v1992_v12, 0.0 }
 0x17b   : > { %2034 = vadd.xlane.f32.xlu1 %v2033_v15  ;;  %v1060_v15 = vadd.s32 4294967288, %v3812_v1 }
 0x17c   : > { %2037 = vadd.xlane.f32.xlu0 %v2036_v17 }
 0x17f   : > { %2040 = vadd.xlane.f32.xlu1 %v2039_v21  ;;  %v4022_v21 = vsub.s32 %v3812_v1, %v3627_v3 }
 0x1cc   : > { %v949_v24 = vpop.xlane.xlu0 %948 }
 0x1cd   : > { %v993_v47 = vmax.f32 %v949_v24, 1e-24 }
 0x1ce   : > { %v955_v27 = vpop.xlane.xlu1 %954 }
 0x1cf   : > { %v995_v53 = vmax.f32 %v955_v27, 1e-24 }
 0x1d0   : > { %v946_v29 = vpop.xlane.xlu0 %945 }
 0x1d1   : > { %v992_v39 = vmax.f32 %v946_v29, 1e-24 }
 0x1d3   : > { %3269 = vrsqrt.f32 %v992_v39 }
 0x1d4   : > { %v952_v30 = vpop.xlane.xlu0 %951  ;;  %v961_v31 = vpop.xlane.xlu1 %960  ;;  %3271 = vrsqrt.f32 %v993_v47 }
 0x1d5   : > { %v994_v48 = vmax.f32 %v952_v30, 1e-24  ;;  %v997_v60 = vmax.f32 %v961_v31, 1e-24  ;;  %v4029_v31 = vsub.s32 %v1060_v15, %v3627_v3 }
 0x1d7   : > { %3273 = vrsqrt.f32 %v994_v48 }
 0x1d8   : > { %v967_v5 = vpop.xlane.xlu1 %966  ;;  %v958_v36 = vpop.xlane.xlu0 %957  ;;  %3275 = vrsqrt.f32 %v995_v53 }
 0x1d9   : > { %v996_v56 = vmax.f32 %v958_v36, 1e-24  ;;  %v999_v17 = vmax.f32 %v967_v5, 1e-24 }
 0x1db   : > { %3277 = vrsqrt.f32 %v996_v56 }
 0x1dc   : > { %v964_v41 = vpop.xlane.xlu0 %963  ;;  %v973_v42 = vpop.xlane.xlu1 %972  ;;  %3279 = vrsqrt.f32 %v997_v60 }
 0x1dd   : > { %v998_v63 = vmax.f32 %v964_v41, 1e-24  ;;  %v3270_v30 = vpop.eup %3269  ;;  %v1001_v36 = vmax.f32 %v973_v42, 1e-24 }
 0x1de   : > { %v3272_v39 = vpop.eup %3271  ;;  %v1059_v5 = vrot.slane %v3270_v30, %v4022_v21  ;;  %v1024_v3 = vmul.f32 %v3270_v30, %v3827_v7 }
 0x1df   : > { %3281 = vrsqrt.f32 %v998_v63  ;;  %v1025_v59 = vmul.f32 %v3272_v39, %v3819_v4 }
 0x1e0   : > { %v979_v50 = vpop.xlane.xlu1 %978  ;;  %v970_v51 = vpop.xlane.xlu0 %969  ;;  %3283 = vrsqrt.f32 %v999_v17 }
 0x1e1   : > { %v1000_v24 = vmax.f32 %v970_v51, 1e-24  ;;  %v3274_v1 = vpop.eup %3273  ;;  %v1064_v51 = vrot.slane %v3272_v39, %v4029_v31  ;;  %v1003_v53 = vmax.f32 %v979_v50, 1e-24 }
 0x1e2   : > { %v3276_v56 = vpop.eup %3275  ;;  %v1070_v63 = vrot.slane %v3274_v1, %v4022_v21  ;;  %v1026_v30 = vmul.f32 %v3274_v1, %v3835_v11 }
 0x1e3   : > { %3285 = vrsqrt.f32 %v1000_v24  ;;  %v1066_v42 = vsel %vm1065_vm5, %v1064_v51, %v1059_v5  ;;  %v1027_v50 = vmul.f32 %v3276_v56, %v3832_v8 }
 0x1e4   : > { %v976_v10 = vpop.xlane.xlu0 %975  ;;  %v4017_v12 = vpop.xlane.xlu1 %984  ;;  %3287 = vrsqrt.f32 %v1001_v36  ;;  %v1074_v36 = vrot.slane %v3276_v56, %v4029_v31  ;;  %v4041_v7 = vmul.f32 %v1066_v42, %v1024_v3  ;;  %v4045_v51 = vmul.f32 %v1066_v42, %v1025_v59 }
 0x1e5   : > { %v3278_v60 = vpop.eup %3277  ;;  %v1002_v15 = vmax.f32 %v976_v10, 1e-24  ;;  %v1005_v4 = vmax.f32 %v4017_v12, 1e-24 }
 0x1e6   : > { %v3280_v2 = vpop.eup %3279  ;;  %v1079_v10 = vrot.slane %v3278_v60, %v4022_v21 }
 0x1e7   : > { %v1083_v8 = vrot.slane %v3280_v2, %v4029_v31  ;;  %v1029_v1 = vmul.f32 %v3280_v2, %v3848_v19 }
 0x1e8   : > { %v4024_v27 = vpop.xlane.xlu1 %990  ;;  %v4026_v29 = vpop.xlane.xlu0 %981 }
 0x1e9   : > { %v1007_v59 = vmax.f32 %v4024_v27, 1e-24  ;;  %v1004_v2 = vmax.f32 %v4026_v29, 1e-24 }
 0x1ec   : > { %v1999_v41 = vpop.xlane.xlu1 %1998  ;;  %v4032_v47 = vpop.xlane.xlu0 %987 }
 0x1ed   : > { %v2043_v48 = vmax.f32 %v1999_v41, 1e-24  ;;  %v3282_v41 = vpop.eup %3281 }
 0x1ee   : > { %v3284_v5 = vpop.eup %3283 }
 0x1ef   : > { %3289 = vrsqrt.f32 %v2043_v48  ;;  %v1075_v48 = vsel %vm1065_vm5, %v1074_v36, %v1070_v63  ;;  %v3286_v11 = vpop.eup %3285  ;;  %v1092_v12 = vrot.slane %v3284_v5, %v4029_v31 }
 0x1f0   : > { %v1996_v17 = vpop.xlane.xlu1 %1995  ;;  %v2002_v24 = vpop.xlane.xlu0 %2001  ;;  %3291 = vrsqrt.f32 %v1003_v53  ;;  %v1088_v53 = vrot.slane %v3282_v41, %v4022_v21  ;;  %v4054_v63 = vmul.f32 %v1075_v48, %v1026_v30  ;;  %v1097_v27 = vrot.slane %v3286_v11, %v4022_v21 }
 0x1f1   : > { %v2042_v6 = vmax.f32 %v1996_v17, 1e-24  ;;  %v2044_v25 = vmax.f32 %v2002_v24, 1e-24  ;;  %v3288_v17 = vpop.eup %3287  ;;  %v4058_v24 = vmul.f32 %v1075_v48, %v1027_v50  ;;  %v1031_v30 = vmul.f32 %v3284_v5, %v3855_v22 }
 0x1f2   : > { %v1101_v29 = vrot.slane %v3288_v17, %v4029_v31  ;;  %v1006_v22 = vmax.f32 %v4032_v47, 1e-24 }
 0x1f3   : > { %3293 = vrsqrt.f32 %v2042_v6  ;;  %v1028_v6 = vmul.f32 %v3278_v60, %v3850_v20  ;;  %v1093_v20 = vsel %vm1065_vm5, %v1092_v12, %v1088_v53 }
 0x1f4   : > { %3295 = vrsqrt.f32 %v1002_v15  ;;  %v2005_v39 = vpop.xlane.xlu1 %2004  ;;  %v1084_v15 = vsel %vm1065_vm5, %v1083_v8, %v1079_v10  ;;  %v1032_v8 = vmul.f32 %v3286_v11, %v3874_v33 }
 0x1f5   : > { %3297 = vrsqrt.f32 %v2044_v25  ;;  %v2045_v56 = vmax.f32 %v2005_v39, 1e-24  ;;  %v2008_v3 = vpop.xlane.xlu0 %2007  ;;  %v1030_v25 = vmul.f32 %v3282_v41, %v3859_v26  ;;  %v4065_v10 = vmul.f32 %v1084_v15, %v1028_v6 }
 0x1f6   : > { %v2046_v42 = vmax.f32 %v2008_v3, 1e-24  ;;  %v4067_v39 = vmul.f32 %v1084_v15, %v1029_v1  ;;  %v1033_v26 = vmul.f32 %v3288_v17, %v3872_v32  ;;  %v1102_v3 = vsel %vm1065_vm5, %v1101_v29, %v1097_v27 }
 0x1f7   : > { %3299 = vrsqrt.f32 %v2045_v56  ;;  %v4077_v56 = vmul.f32 %v1093_v20, %v1031_v30 }
 0x1f8   : > { %3301 = vrsqrt.f32 %v1005_v4  ;;  %v2011_v19 = vpop.xlane.xlu1 %2010  ;;  %v4073_v4 = vmul.f32 %v1093_v20, %v1030_v25  ;;  %v4092_v25 = vmul.f32 %v1102_v3, %v1032_v8 }
 0x1f9   : > { %3303 = vrsqrt.f32 %v2046_v42  ;;  %v2047_v60 = vmax.f32 %v2011_v19, 1e-24  ;;  %v2014_v36 = vpop.xlane.xlu0 %2013  ;;  %v3290_v48 = vpop.eup %3289 }
 0x1fa   : > { %3305 = vrsqrt.f32 %v1007_v59  ;;  %v2048_v50 = vmax.f32 %v2014_v36, 1e-24  ;;  %v4071_v41 = vpop.eup %3291  ;;  %v2113_v59 = vrot.slane %v3290_v48, %v4029_v31  ;;  %v2075_v17 = vmul.f32 %v3290_v48, %v3920_v55 }
 0x1fb   : > { %3307 = vrsqrt.f32 %v2047_v60  ;;  %v4087_v47 = vmul.f32 %v4071_v41, %v3879_v34  ;;  %v1110_v15 = vrot.slane %v4071_v41, %v4029_v31 }
 0x1fc   : > { %3309 = vrsqrt.f32 %v1004_v2  ;;  %v2017_v5 = vpop.xlane.xlu1 %2016 }
 0x1fd   : > { %v3294_v53 = vpop.eup %3293  ;;  %3311 = vrsqrt.f32 %v2048_v50  ;;  %v2049_v32 = vmax.f32 %v2017_v5, 1e-24  ;;  %v2020_v1 = vpop.xlane.xlu0 %2019  ;;  %v4098_v50 = vmul.f32 %v1102_v3, %v1033_v26 }
 0x1fe   : > { %v4080_v6 = vpop.eup %3295  ;;  %v2074_v42 = vmul.f32 %v3294_v53, %v3922_v9  ;;  %v2109_v33 = vrot.slane %v3294_v53, %v4022_v21  ;;  %v2050_v11 = vmax.f32 %v2020_v1, 1e-24 }
 0x1ff   : > { %v3298_v12 = vpop.eup %3297  ;;  %3313 = vrsqrt.f32 %v2049_v32  ;;  %v4102_v55 = vmul.f32 %v4080_v6, %v3883_v37 }
 0x200   : > { %3315 = vrsqrt.f32 %v1006_v22  ;;  %v2114_v2 = vsel %vm1065_vm5, %v2113_v59, %v2109_v33  ;;  %v2118_v9 = vrot.slane %v3298_v12, %v4022_v21  ;;  %v2023_v19 = vpop.xlane.xlu1 %2022  ;;  %v1106_v22 = vrot.slane %v4080_v6, %v4022_v21 }
 0x201   : > { %v3300_v20 = vpop.eup %3299  ;;  %v2234_v27 = vmul.f32 %v2114_v2, %v2074_v42  ;;  %v2235_v60 = vmul.f32 %v2114_v2, %v2075_v17  ;;  %3317 = vrsqrt.f32 %v2050_v11  ;;  %v2051_v34 = vmax.f32 %v2023_v19, 1e-24  ;;  %v2026_v36 = vpop.xlane.xlu0 %2025 }
 0x202   : > { %v4096_v30 = vpop.eup %3301  ;;  %v2077_v48 = vmul.f32 %v3300_v20, %v3927_v57  ;;  %v2122_v29 = vrot.slane %v3300_v20, %v4029_v31  ;;  %v2076_v32 = vmul.f32 %v3298_v12, %v3931_v62  ;;  %v2052_v57 = vmax.f32 %v2026_v36, 1e-24 }
 0x203   : > { %v3304_v8 = vpop.eup %3303  ;;  %v2250_v5 = vsub.f32 %v4041_v7, %v2234_v27  ;;  %v2251_v53 = vsub.f32 %v4045_v51, %v2235_v60  ;;  %3319 = vrsqrt.f32 %v2051_v34 }
 0x204   : > { %v4111_v26 = vpop.eup %3305  ;;  %v2123_v3 = vsel %vm1065_vm5, %v2122_v29, %v2118_v9  ;;  %v2127_v37 = vrot.slane %v3304_v8, %v4022_v21  ;;  %v2029_v1 = vpop.xlane.xlu1 %2028  ;;  %v2078_v51 = vmul.f32 %v3304_v8, %v3947_v18  ;;  %3321 = vrsqrt.f32 %v2052_v57 }
 0x205   : > { %v3308_v59 = vpop.eup %3307  ;;  %v2266_v42 = vmul.f32 %v2250_v5, %v2250_v5  ;;  %v2267_v33 = vmul.f32 %v2251_v53, %v2251_v53  ;;  %v2236_v11 = vmul.f32 %v2123_v3, %v2076_v32  ;;  %v2237_v6 = vmul.f32 %v2123_v3, %v2077_v48  ;;  %v2032_v17 = vpop.xlane.xlu0 %2031 }
 0x206   : > { %v4115_v7 = vpop.eup %3309  ;;  %v2079_v62 = vmul.f32 %v3308_v59, %v3944_v16  ;;  %v2131_v12 = vrot.slane %v3308_v59, %v4029_v31  ;;  %v2053_v2 = vmax.f32 %v2029_v1, 1e-24 }
 0x207   : > { %v3312_v9 = vpop.eup %3311  ;;  %v2282_v19 = vsel %vm943_vm3, %v2266_v42, 0.0  ;;  %v2283_v20 = vsel %vm943_vm3, %v2267_v33, 0.0  ;;  %v2252_v27 = vsub.f32 %v4054_v63, %v2236_v11  ;;  %v2253_v60 = vsub.f32 %v4058_v24, %v2237_v6 }
 0x208   : > { %v2284_v34 = vadd.f32 %v2283_v20, %v2282_v19  ;;  %v2132_v36 = vsel %vm1065_vm5, %v2131_v12, %v2127_v37  ;;  %v2136_v48 = vrot.slane %v3312_v9, %v4022_v21  ;;  %v2035_v53 = vpop.xlane.xlu1 %2034  ;;  %3323 = vrsqrt.f32 %v2053_v2 }
 0x209   : > { %v3314_v18 = vpop.eup %3313  ;;  %v2268_v16 = vmul.f32 %v2252_v27, %v2252_v27  ;;  %v2269_v29 = vmul.f32 %v2253_v60, %v2253_v60  ;;  %v2238_v8 = vmul.f32 %v2132_v36, %v2078_v51  ;;  %v2239_v5 = vmul.f32 %v2132_v36, %v2079_v62  ;;  %v2038_v33 = vpop.xlane.xlu0 %2037 }
 0x20a   : > { %v4126_v32 = vpop.eup %3315  ;;  %v2081_v3 = vmul.f32 %v3314_v18, %v3952_v23  ;;  %v2140_v63 = vrot.slane %v3314_v18, %v4029_v31  ;;  %v2054_v24 = vmax.f32 %v2032_v17, 1e-24  ;;  %v2080_v42 = vmul.f32 %v3312_v9, %v3958_v28 }
 0x20b   : > { %v3318_v1 = vpop.eup %3317  ;;  %v2285_v37 = vsel %vm943_vm3, %v2268_v16, 0.0  ;;  %v2254_v59 = vsub.f32 %v4065_v10, %v2238_v8  ;;  %v2255_v57 = vsub.f32 %v4067_v39, %v2239_v5  ;;  %v2287_v6 = vsel %vm943_vm3, %v2269_v29, 0.0 }
 0x20c   : > { %v2286_v11 = vadd.f32 %v2285_v37, %v2284_v34  ;;  %v2141_v51 = vsel %vm1065_vm5, %v2140_v63, %v2136_v48  ;;  %v2145_v23 = vrot.slane %v3318_v1, %v4022_v21  ;;  %3325 = vrsqrt.f32 %v2054_v24  ;;  %v2041_v34 = vpop.xlane.xlu1 %2040 }
 0x20d   : > { %v2270_v62 = vmul.f32 %v2254_v59, %v2254_v59  ;;  %v2271_v12 = vmul.f32 %v2255_v57, %v2255_v57  ;;  %v2240_v17 = vmul.f32 %v2141_v51, %v2080_v42  ;;  %v2241_v2 = vmul.f32 %v2141_v51, %v2081_v3  ;;  %v3320_v19 = vpop.eup %3319 }
 0x20e   : > { %v2288_v20 = vadd.f32 %v2287_v6, %v2286_v11  ;;  %v2055_v10 = vmax.f32 %v2035_v53, 1e-24  ;;  %v2056_v27 = vmax.f32 %v2038_v33, 1e-24  ;;  %v1111_v28 = vsel %vm1065_vm5, %v1110_v15, %v1106_v22  ;;  %v3322_v15 = vpop.eup %3321 }
 0x20f   : > { %v2289_v39 = vsel %vm943_vm3, %v2270_v62, 0.0  ;;  %v2256_v9 = vsub.f32 %v4073_v4, %v2240_v17  ;;  %v2257_v60 = vsub.f32 %v4077_v56, %v2241_v2  ;;  %v2083_v48 = vmul.f32 %v3320_v19, %v3968_v35 }
 0x210   : > { %v2290_v36 = vadd.f32 %v2289_v39, %v2288_v20  ;;  %v2149_v18 = vrot.slane %v3320_v19, %v4029_v31  ;;  %3327 = vrsqrt.f32 %v2055_v10  ;;  %v2291_v16 = vsel %vm943_vm3, %v2271_v12, 0.0 }
 0x211   : > { %v2272_v29 = vmul.f32 %v2256_v9, %v2256_v9  ;;  %v2273_v8 = vmul.f32 %v2257_v60, %v2257_v60  ;;  %v2082_v41 = vmul.f32 %v3318_v1, %v3971_v38  ;;  %3329 = vrsqrt.f32 %v2056_v27 }
 0x212   : > { %v2292_v22 = vadd.f32 %v2291_v16, %v2290_v36  ;;  %v2150_v5 = vsel %vm1065_vm5, %v2149_v18, %v2145_v23  ;;  %v2057_v4 = vmax.f32 %v2041_v34, 1e-24  ;;  %v2154_v3 = vrot.slane %v3322_v15, %v4022_v21  ;;  %v3324_v63 = vpop.eup %3323 }
 0x213   : > { %v2242_v56 = vmul.f32 %v2150_v5, %v2082_v41  ;;  %v2243_v53 = vmul.f32 %v2150_v5, %v2083_v48  ;;  %v2293_v35 = vsel %vm943_vm3, %v2272_v29, 0.0  ;;  %v1115_v24 = vrot.slane %v4115_v7, %v4022_v21 }
 0x214   : > { %3331 = vrsqrt.f32 %v2057_v4  ;;  %v2294_v37 = vadd.f32 %v2293_v35, %v2292_v22  ;;  %v2295_v38 = vsel %vm943_vm3, %v2273_v8, 0.0  ;;  %v2085_v57 = vmul.f32 %v3324_v63, %v3976_v40 }
 0x215   : > { %v2258_v1 = vsub.f32 %v4092_v25, %v2242_v56  ;;  %v2259_v59 = vsub.f32 %v4098_v50, %v2243_v53  ;;  %v2158_v42 = vrot.slane %v3324_v63, %v4029_v31  ;;  %v1202_v33 = vmul.f32 %v1111_v28, %v4102_v55 }
 0x216   : > { %v1119_v11 = vrot.slane %v4096_v30, %v4029_v31  ;;  %v2084_v6 = vmul.f32 %v3322_v15, %v3982_v45  ;;  %v2296_v51 = vadd.f32 %v2295_v38, %v2294_v37  ;;  %v1036_v23 = vmul.f32 %v4115_v7, %v3898_v44  ;;  %v3326_v50 = vpop.eup %3325 }
 0x217   : > { %v2159_v62 = vsel %vm1065_vm5, %v2158_v42, %v2154_v3  ;;  %v2274_v25 = vmul.f32 %v2258_v1, %v2258_v1  ;;  %v2275_v12 = vmul.f32 %v2259_v59, %v2259_v59  ;;  %v1203_v55 = vmul.f32 %v1111_v28, %v4087_v47 }
 0x218   : > { %v2244_v17 = vmul.f32 %v2159_v62, %v2084_v6  ;;  %v2245_v40 = vmul.f32 %v2159_v62, %v2085_v57  ;;  %v1120_v2 = vsel %vm1065_vm5, %v1119_v11, %v1115_v24  ;;  %v1037_v19 = vmul.f32 %v4096_v30, %v3896_v43 }
 0x219   : > { %v1128_v45 = vrot.slane %v4111_v26, %v4029_v31  ;;  %v2163_v20 = vrot.slane %v3326_v50, %v4022_v21  ;;  %v2297_v44 = vsel %vm943_vm3, %v2274_v25, 0.0  ;;  %v1124_v10 = vrot.slane %v4126_v32, %v4022_v21 }
 0x21a   : > { %v3328_v7 = vpop.eup %3327  ;;  %v2260_v27 = vsub.f32 %v1202_v33, %v2244_v17  ;;  %v2261_v39 = vsub.f32 %v1203_v55, %v2245_v40  ;;  %v2298_v9 = vadd.f32 %v2297_v44, %v2296_v51  ;;  %v1204_v28 = vmul.f32 %v1120_v2, %v1036_v23 }
 0x21b   : > { %v2087_v60 = vmul.f32 %v3328_v7, %v3992_v52  ;;  %v2167_v47 = vrot.slane %v3328_v7, %v4029_v31  ;;  %v2299_v43 = vsel %vm943_vm3, %v2275_v12, 0.0  ;;  %v3330_v30 = vpop.eup %3329  ;;  %v2086_v34 = vmul.f32 %v3326_v50, %v3995_v54  ;;  %v4372_v7 = vld [vmem:[#allocation12_spill] sm:$0xff] (!%p4371_p13) }
 0x21c   : > { %v2276_v36 = vmul.f32 %v2260_v27, %v2260_v27  ;;  %v2277_v48 = vmul.f32 %v2261_v39, %v2261_v39  ;;  %v2300_v18 = vadd.f32 %v2299_v43, %v2298_v9  ;;  %v2172_v16 = vrot.slane %v3330_v30, %v4022_v21 }
 0x21d   : > { %v1038_v29 = vmul.f32 %v4126_v32, %v3907_v49  ;;  %v1205_v8 = vmul.f32 %v1120_v2, %v1037_v19  ;;  %v2168_v41 = vsel %vm1065_vm5, %v2167_v47, %v2163_v20  ;;  %v1129_v15 = vsel %vm1065_vm5, %v1128_v45, %v1124_v10 }
 0x21e   : > { %v3332_v52 = vpop.eup %3331  ;;  %v2246_v22 = vmul.f32 %v2168_v41, %v2086_v34  ;;  %v2247_v5 = vmul.f32 %v2168_v41, %v2087_v60  ;;  %v2301_v4 = vsel %vm943_vm3, %v2276_v36, 0.0  ;;  %v1039_v56 = vmul.f32 %v4111_v26, %v3903_v46 }
 0x21f   : > { %v2176_v54 = vrot.slane %v3332_v52, %v4029_v31  ;;  %v2089_v53 = vmul.f32 %v3332_v52, %v4003_v61  ;;  %v2302_v3 = vadd.f32 %v2301_v4, %v2300_v18  ;;  %v2088_v49 = vmul.f32 %v3330_v30, %v4006_v0 }
 0x220   : > { %v2262_v32 = vsub.f32 %v1204_v28, %v2246_v22  ;;  %v2263_v35 = vsub.f32 %v1205_v8, %v2247_v5  ;;  %v2303_v63 = vsel %vm943_vm3, %v2277_v48, 0.0  ;;  %v1206_v24 = vmul.f32 %v1129_v15, %v1038_v29 }
 0x221   : > { %v1207_v37 = vmul.f32 %v1129_v15, %v1039_v56  ;;  %v2177_v38 = vsel %vm1065_vm5, %v2176_v54, %v2172_v16  ;;  %v2304_v1 = vadd.f32 %v2303_v63, %v2302_v3  ;;  %v3171_v44 = vpack.c.bf16 (!%p4371_p13), %v3640_v14, %v3638_v13 }
 0x222   : > { %v2248_v59 = vmul.f32 %v2177_v38, %v2088_v49  ;;  %v2249_v57 = vmul.f32 %v2177_v38, %v2089_v53  ;;  %v2278_v42 = vmul.f32 %v2262_v32, %v2262_v32  ;;  %v2279_v33 = vmul.f32 %v2263_v35, %v2263_v35 }
 0x223   : > { %v3177_v10 = vpack.c.bf16 (!%p4371_p13), %v4372_v7, %v3704_v58  ;;  %3173 = vmatprep.subr.msk.bf16.mxu0 (!%p4371_p13), %vm3652_vm1, %v3171_v44 }
 0x224   : > { %v2264_v11 = vsub.f32 %v1206_v24, %v2248_v59  ;;  %v2265_v46 = vsub.f32 %v1207_v37, %v2249_v57  ;;  %v2305_v61 = vsel %vm943_vm3, %v2278_v42, 0.0  ;;  %v2307_v51 = vsel %vm943_vm3, %v2279_v33, 0.0  ;;  %3176 = vmatpush3.bf16.xpose.msk.msra.mxu0 (!%p4371_p13), %vm3652_vm1, %v3171_v44 }
 0x225   : > { %v2306_v26 = vadd.f32 %v2305_v61, %v2304_v1  ;;  %3179 = vmatprep.subr.msk.bf16.mxu1 (!%p4371_p13), %vm3652_vm1, %v3177_v10 }
 0x226   : > { %v2280_v6 = vmul.f32 %v2264_v11, %v2264_v11  ;;  %v2281_v0 = vmul.f32 %v2265_v46, %v2265_v46  ;;  %3182 = vmatpush3.bf16.xpose.msk.msra.mxu1 (!%p4371_p13), %vm3652_vm1, %v3177_v10  ;;  %v3482_v46 = vmov (!%p4371_p13), 0.0  }
 0x227   : > { %v2308_v23 = vadd.f32 %v2307_v51, %v2306_v26 }
 0x228   : > { %v2309_v62 = vsel %vm943_vm3, %v2280_v6, 0.0  ;;  %v2311_v12 = vsel %vm943_vm3, %v2281_v0, 0.0 }
 0x229   : > { %v2310_v25 = vadd.f32 %v2309_v62, %v2308_v23 }
 0x22b   : > { %v2312_v50 = vadd.f32 %v2311_v12, %v2310_v25  ;;  %3066 = vmatmul.mubr.msk.f32.vlgmr.msra.gmra.mrb[0].mxu0 (!%p4371_p13), %vm274_vm0, %v3640_v14 }
 0x22d   : > { %2313 = vadd.xlane.f32.xlu0 %v2312_v50  ;;  %3073 = vmatmul.mubr.msk.f32.vlgmr.msra.gmra.mrb[0].mxu1 (!%p4371_p13), %vm274_vm0, %v4372_v7 }
 0x2ba   : > { %v2314_v17 = vpop.xlane.xlu0 %2313 }
 0x2bb   : > { %v2315_v40 = vrot.slane %v2314_v17, 4 }
 0x2bd   : > { %v2316_v2 = vadd.f32 %v2315_v40, %v2314_v17 }
 0x2bf   : > { %v2317_v55 = vrot.slane %v2316_v2, 2 }
 0x2c1   : > { %v2318_v19 = vadd.f32 %v2317_v55, %v2316_v2 }
 0x2c3   : > { %v2319_v45 = vrot.slane %v2318_v19, 1 }
 0x2c5   : > { %v2320_v20 = vadd.f32 %v2319_v45, %v2318_v19 }
 0x2c7   : > { %3183 = vpush %v2320_v20 }
 0x2f3   : > { %2326 = sbr.rel (%p4371_p13) target bundleno = 1679 (0x68f), region = 40 }
 0x2f8   : > { %s4196_s7 = spop %3183 }
 0x2f9   : > { %s2322_s8 = smul.f32 0.00024414063, %s4196_s7 }
 0x2fe   : > { %v3067_v13 = vpop.f32.mrb[0].mxu0 }
 0x2ff   : > { %v2399_v58 = vpop.f32.mrb[1].mxu0  ;;  %v2409_v28 = vsel %vm3815_vm2, %v3067_v13, 0.0  ;;  %v2437_v41 = vmul.f32 2.0, %v3067_v13 }
 0x300   : > { %v2408_v9 = vsel %vm3823_vm4, %v2399_v58, 0.0  ;;  %v2413_v43 = vsel %vm943_vm3, %v2409_v28, 0.0  ;;  %v4230_v30 = vpop.f32.mrb[0].mxu1  ;;  %v2436_v52 = vmul.f32 2.0, %v2399_v58 }
 0x301   : > { %v2410_v60 = vsel %vm943_vm3, %v2408_v9, 0.0  ;;  %v4232_v14 = vpop.f32.mrb[1].mxu1  ;;  %v2582_v25 = vsel %vm3815_vm2, %v4230_v30, 0.0 }
 0x302   : > { %2411 = vadd.xlane.f32.xlu0 %v2410_v60  ;;  %v2581_v34 = vsel %vm3823_vm4, %v4232_v14, 0.0  ;;  %v2586_v12 = vsel %vm943_vm3, %v2582_v25, 0.0 }
 0x303   : > { %v2583_v36 = vsel %vm943_vm3, %v2581_v34, 0.0  ;;  %v2609_v34 = vmul.f32 2.0, %v4232_v14 }
 0x306   : > { %2414 = vadd.xlane.f32.xlu0 %v2413_v43  ;;  %v2610_v43 = vmul.f32 2.0, %v4230_v30 }
 0x30a   : > { %2584 = vadd.xlane.f32.xlu0 %v2583_v36 }
 0x38f   : > { %v2412_v48 = vpop.xlane.xlu0 %2411 }
 0x390   : > { %v2421_v16 = vrot.slane %v2412_v48, %v4022_v21 }
 0x393   : > { %v2415_v18 = vpop.xlane.xlu0 %2414 }
 0x394   : > { %v2425_v29 = vrot.slane %v2415_v18, %v4029_v31 }
 0x396   : > { %v2426_v8 = vsel %vm1065_vm5, %v2425_v29, %v2421_v16 }
 0x397   : > { %v2434_v15 = vadd.f32 %v2426_v8, %v2412_v48  ;;  %v2435_v22 = vadd.f32 %v2426_v8, %v2415_v18  ;;  %v2585_v55 = vpop.xlane.xlu0 %2584 }
 0x398   : > { %v2594_v44 = vrot.slane %v2585_v55, %v4022_v21 }
 0x399   : > { %v2438_v5 = vsub.f32 %v2434_v15, %v2436_v52  ;;  %v2439_v4 = vsub.f32 %v2435_v22, %v2437_v41 }
 0x39b   : > { %v2440_v54 = vmax.f32 %v2438_v5, 1e-12  ;;  %v2441_v56 = vmax.f32 %v2439_v4, 1e-12 }
 0x39d   : > { %3333 = vrsqrt.f32 %v2440_v54  ;;  %vm2444_vm6 = vcmp.eq.f32.partialorder %v2440_v54, inf  ;;  %v2447_v32 = vand.u32 2147483648, %v2440_v54  ;;  %vm2446_vm7 = vcmp.eq.f32.partialorder %v2440_v54, 0.0 }
 0x39e   : > { %3335 = vrsqrt.f32 %v2441_v56  ;;  %vm2451_vm8 = vcmp.eq.f32.partialorder %v2441_v56, inf  ;;  %v2454_v24 = vand.u32 2147483648, %v2441_v56  ;;  %vm2453_vm9 = vcmp.eq.f32.partialorder %v2441_v56, 0.0 }
 0x3a7   : > { %v3334_v53 = vpop.eup %3333 }
 0x3a8   : > { %v3336_v3 = vpop.eup %3335  ;;  %v2443_v49 = vmul.f32 %v3334_v53, %v2440_v54 }
 0x3a9   : > { %v2450_v35 = vmul.f32 %v3336_v3, %v2441_v56 }
 0x3aa   : > { %v2445_v63 = vsel %vm2444_vm6, %v2440_v54, %v2443_v49 }
 0x3ab   : > { %v2448_v37 = vsel %vm2446_vm7, %v2447_v32, %v2445_v63  ;;  %v2452_v38 = vsel %vm2451_vm8, %v2441_v56, %v2450_v35 }
 0x3ac   : > { %v2455_v1 = vsel %vm2453_vm9, %v2454_v24, %v2452_v38  ;;  %v4243_v59 = vsel %vm3823_vm4, 0.0, %v2448_v37 }
 0x3ad   : > { %v4247_v57 = vsel %vm3815_vm2, 0.0, %v2455_v1  ;;  %vm2458_vm10 = vcmp.gt.f32.partialorder %v4243_v59, 0.0 }
 0x3ae   : > { %vm2459_vm11 = vcmp.gt.f32.partialorder %v4247_v57, 0.0  ;;  %v2460_v42 = vsel %vm2458_vm10, %v4243_v59, 0.0  ;;  %v2864_v61 = vsel %vm2458_vm10, 1.0, %v3482_v46 }
 0x3af   : > { %v2461_v33 = vsel %vm2459_vm11, %v4247_v57, 0.0  ;;  %v2462_v11 = vsel %vm943_vm3, %v2460_v42, 0.0  ;;  %v2865_v26 = vsel %vm2459_vm11, 1.0, %v3482_v46  ;;  %v2478_v51 = vsel %vm943_vm3, %v2864_v61, 0.0 }
 0x3b0   : > { %v2463_v6 = vsel %vm943_vm3, %v2461_v33, 0.0  ;;  %v2479_v23 = vsel %vm943_vm3, %v2865_v26, 0.0 }
 0x3b1   : > { %v2464_v0 = vadd.f32 %v2463_v6, %v2462_v11  ;;  %v2480_v62 = vadd.f32 %v2479_v23, %v2478_v51 }
 0x3b3   : > { %2465 = vadd.xlane.f32.xlu1 %v2464_v0 }
 0x3b7   : > { %2481 = vadd.xlane.f32.xlu1 %v2480_v62 }
 0x3bb   : > { %2587 = vadd.xlane.f32.xlu1 %v2586_v12 }
 0x440   : > { %v2466_v50 = vpop.xlane.xlu1 %2465 }
 0x441   : > { %v2467_v17 = vrot.slane %v2466_v50, 4 }
 0x443   : > { %v2468_v40 = vadd.f32 %v2467_v17, %v2466_v50 }
 0x444   : > { %v2482_v2 = vpop.xlane.xlu1 %2481 }
 0x445   : > { %v2469_v19 = vrot.slane %v2468_v40, 2  ;;  %v2483_v45 = vrot.slane %v2482_v2, 4 }
 0x447   : > { %v2484_v20 = vadd.f32 %v2483_v45, %v2482_v2  ;;  %v2470_v7 = vadd.f32 %v2469_v19, %v2468_v40 }
 0x448   : > { %v2588_v10 = vpop.xlane.xlu1 %2587 }
 0x449   : > { %v2485_v27 = vrot.slane %v2484_v20, 2  ;;  %v2598_v13 = vrot.slane %v2588_v10, %v4029_v31  ;;  %v2471_v58 = vrot.slane %v2470_v7, 1 }
 0x44b   : > { %v2599_v9 = vsel %vm1065_vm5, %v2598_v13, %v2594_v44  ;;  %v2472_v60 = vadd.f32 %v2471_v58, %v2470_v7  ;;  %v2486_v28 = vadd.f32 %v2485_v27, %v2484_v20 }
 0x44c   : > { %v2607_v36 = vadd.f32 %v2599_v9, %v2585_v55  ;;  %v2608_v48 = vadd.f32 %v2599_v9, %v2588_v10 }
 0x44d   : > { %3185 = vpush %v2472_v60  ;;  %v2487_v18 = vrot.slane %v2486_v28, 1 }
 0x44e   : > { %v2611_v16 = vsub.f32 %v2607_v36, %v2609_v34  ;;  %v2612_v21 = vsub.f32 %v2608_v48, %v2610_v43 }
 0x44f   : > { %v2488_v29 = vadd.f32 %v2487_v18, %v2486_v28 }
 0x450   : > { %v2613_v8 = vmax.f32 %v2611_v16, 1e-12  ;;  %v2614_v41 = vmax.f32 %v2612_v21, 1e-12 }
 0x451   : > { %3187 = vpush %v2488_v29 }
 0x452   : > { %3337 = vrsqrt.f32 %v2614_v41  ;;  %vm2624_vm12 = vcmp.eq.f32.partialorder %v2614_v41, inf  ;;  %v2627_v30 = vand.u32 2147483648, %v2614_v41  ;;  %vm2617_vm13 = vcmp.eq.f32.partialorder %v2613_v8, inf }
 0x453   : > { %3339 = vrsqrt.f32 %v2613_v8  ;;  %v2620_v14 = vand.u32 2147483648, %v2613_v8  ;;  %vm2626_vm14 = vcmp.eq.f32.partialorder %v2614_v41, 0.0  ;;  %vm2619_vm15 = vcmp.eq.f32.partialorder %v2613_v8, 0.0 }
 0x45c   : > { %v3338_v31 = vpop.eup %3337 }
 0x45d   : > { %v3340_v52 = vpop.eup %3339  ;;  %v2623_v15 = vmul.f32 %v3338_v31, %v2614_v41 }
 0x45e   : > { %v2616_v22 = vmul.f32 %v3340_v52, %v2613_v8 }
 0x45f   : > { %v2625_v5 = vsel %vm2624_vm12, %v2614_v41, %v2623_v15 }
 0x460   : > { %v2618_v4 = vsel %vm2617_vm13, %v2613_v8, %v2616_v22  ;;  %v2628_v54 = vsel %vm2626_vm14, %v2627_v30, %v2625_v5 }
 0x461   : > { %v2621_v56 = vsel %vm2619_vm15, %v2620_v14, %v2618_v4  ;;  %v4270_v53 = vsel %vm3815_vm2, 0.0, %v2628_v54 }
 0x462   : > { %v2629_v3 = vsel %vm3823_vm4, 0.0, %v2621_v56  ;;  %vm2632_vm0 = vcmp.gt.f32.partialorder %v4270_v53, 0.0 }
 0x463   : > { %vm2631_vm1 = vcmp.gt.f32.partialorder %v2629_v3, 0.0  ;;  %v2871_v49 = vsel %vm2632_vm0, 1.0, %v3482_v46  ;;  %v2634_v32 = vsel %vm2632_vm0, %v4270_v53, 0.0 }
 0x464   : > { %v2870_v35 = vsel %vm2631_vm1, 1.0, %v3482_v46  ;;  %v2652_v63 = vsel %vm943_vm3, %v2871_v49, 0.0  ;;  %v2633_v24 = vsel %vm2631_vm1, %v2629_v3, 0.0  ;;  %v2636_v37 = vsel %vm943_vm3, %v2634_v32, 0.0 }
 0x465   : > { %v2651_v47 = vsel %vm943_vm3, %v2870_v35, 0.0  ;;  %v2635_v38 = vsel %vm943_vm3, %v2633_v24, 0.0 }
 0x466   : > { %v2653_v39 = vadd.f32 %v2652_v63, %v2651_v47  ;;  %v2637_v1 = vadd.f32 %v2636_v37, %v2635_v38 }
 0x468   : > { %2654 = vadd.xlane.f32.xlu1 %v2653_v39  ;;  %2638 = vadd.xlane.f32.xlu0 %v2637_v1 }
 0x47e   : > { %s3186_s16 = spop %3185 }
 0x482   : > { %s3188_s17 = spop %3187 }
 0x483   : > { %v2490_v42 = vstv %s3188_s17 }
 0x484   : > { %3341 = vrcp.f32 %v2490_v42 }
 0x48e   : > { %v3342_v33 = vpop.eup %3341 }
 0x48f   : > { %3189 = vpush %v3342_v33 }
 0x4c0   : > { %s3190_s22 = spop %3189 }
 0x4c1   : > { %s2493_s25 = smul.f32 %s3190_s22, %s3186_s16 }
 0x4c3   : > { %v2494_v11 = vstv %s2493_s25 }
 0x4c4   : > { %3343 = vrcp.f32 %v2494_v11 }
 0x4ce   : > { %v3344_v46 = vpop.eup %3343 }
 0x4cf   : > { %3191 = vpush %v3344_v46 }
 0x4f5   : > { %v2655_v61 = vpop.xlane.xlu1 %2654  ;;  %v2639_v26 = vpop.xlane.xlu0 %2638 }
 0x4f6   : > { %v2656_v6 = vrot.slane %v2655_v61, 4  ;;  %v2640_v0 = vrot.slane %v2639_v26, 4 }
 0x4f8   : > { %v2657_v51 = vadd.f32 %v2656_v6, %v2655_v61  ;;  %v2641_v23 = vadd.f32 %v2640_v0, %v2639_v26 }
 0x4fa   : > { %v2658_v62 = vrot.slane %v2657_v51, 2  ;;  %v2642_v25 = vrot.slane %v2641_v23, 2 }
 0x4fc   : > { %v2659_v12 = vadd.f32 %v2658_v62, %v2657_v51  ;;  %v2643_v50 = vadd.f32 %v2642_v25, %v2641_v23 }
 0x4fe   : > { %v2644_v17 = vrot.slane %v2643_v50, 1  ;;  %v2660_v40 = vrot.slane %v2659_v12, 1 }
 0x500   : > { %v2645_v2 = vadd.f32 %v2644_v17, %v2643_v50  ;;  %v2661_v55 = vadd.f32 %v2660_v40, %v2659_v12  ;;  %s3192_s27 = spop %3191 }
 0x501   : > { %v2497_v7 = vstv %s3192_s27 }
 0x502   : > { %3193 = vpush %v2645_v2  ;;  %v2498_v27 = vmul.f32 %v2497_v7, %v4243_v59  ;;  %v2499_v13 = vmul.f32 %v2497_v7, %v4247_v57 }
 0x503   : > { %3195 = vpush %v2661_v55 }
 0x533   : > { %s3194_s28 = spop %3193 }
 0x534   : > { %s3196_s29 = spop %3195 }
 0x535   : > { %v2663_v19 = vstv %s3196_s29 }
 0x536   : > { %3345 = vrcp.f32 %v2663_v19 }
 0x540   : > { %v3346_v45 = vpop.eup %3345 }
 0x541   : > { %3197 = vpush %v3346_v45 }
 0x572   : > { %s3198_s30 = spop %3197 }
 0x573   : > { %s2666_s23 = smul.f32 %s3198_s30, %s3194_s28 }
 0x575   : > { %v2667_v20 = vstv %s2666_s23 }
 0x576   : > { %3347 = vrcp.f32 %v2667_v20 }
 0x580   : > { %v3348_v44 = vpop.eup %3347 }
 0x581   : > { %3199 = vpush %v3348_v44 }
 0x5b2   : > { %s3200_s3 = spop %3199 }
 0x5b3   : > { %v2670_v10 = vstv %s3200_s3 }
 0x5b4   : > { %v2671_v58 = vmul.f32 %v2670_v10, %v2629_v3  ;;  %v2672_v9 = vmul.f32 %v2670_v10, %v4270_v53 }
 0x5b6   : > { %v2673_v60 = vsub.f32 %v2498_v27, %v2671_v58  ;;  %v2674_v28 = vsub.f32 %v2499_v13, %v2672_v9 }
 0x5b8   : > { %v2675_v43 = vmul.f32 %v2673_v60, %v2673_v60  ;;  %v2676_v34 = vmul.f32 %v2674_v28, %v2674_v28 }
 0x5ba   : > { %v2677_v36 = vsel %vm943_vm3, %v2675_v43, 0.0  ;;  %v2678_v48 = vsel %vm943_vm3, %v2676_v34, 0.0 }
 0x5bb   : > { %v2679_v18 = vadd.f32 %v2678_v48, %v2677_v36 }
 0x5bd   : > { %2680 = vadd.xlane.f32.xlu0 %v2679_v18 }
 0x64a   : > { %v2681_v16 = vpop.xlane.xlu0 %2680 }
 0x64b   : > { %v2682_v21 = vrot.slane %v2681_v16, 4 }
 0x64d   : > { %v2683_v59 = vadd.f32 %v2682_v21, %v2681_v16 }
 0x64f   : > { %v2684_v29 = vrot.slane %v2683_v59, 2 }
 0x651   : > { %v2685_v57 = vadd.f32 %v2684_v29, %v2683_v59 }
 0x653   : > { %v2686_v8 = vrot.slane %v2685_v57, 1 }
 0x655   : > { %v2687_v41 = vadd.f32 %v2686_v8, %v2685_v57 }
 0x657   : > { %3201 = vpush %v2687_v41 }
 0x688   : > { %s3202_s4 = spop %3201 }
 0x689   : > { %s2689_s21 = smul.f32 0.00390625, %s3202_s4 }
 0x68b   : > { %s2690_s26 = sadd.f32 %s2689_s21, %s2322_s8 }
 0x68d   : > { %v2691_v31 = vstv %s2690_s26 }
 0x68e   : > { %2692 = vst [vmem:[%s4200_s14] sm:$0xff] %v2691_v31 }
 0x68f PF: > { %p4376_p10 = scmp.eq.s32.totalorder %s3520_s13, 0 }
 0x690   : > { %v2697_v52 = vstv (!%p4376_p10), %s2322_s8 }
 0x691   : > { %2696 = sbr.rel (%p4376_p10) target bundleno = 1688 (0x698), region = 44  ;;  %2698 = vst [vmem:[%s4200_s14] sm:$0xff] (!%p4376_p10), %v2697_v52 }
 0x698 PF: > { %s2874_s5 = sshll.u32 %s3520_s13, 7  ;;  %s2713_s22 = sshll.u32 %s4200_s14, 4  ;;  %s2714_s22 = int_to_ptr.vmem [resolvable:$true] %s2713_s22 }
 0x699   : > { %s4299_s17 = scalar_lea.hbm %s4340_s2, %s2874_s5  ;;  %s2700_s25 = scalar_lea.sflag [#allocation4], %s149_s24 }
 0x69a   : > { %s3405_s27 = scalar_lea.vmem %s2714_s22, 128  ;;  %p4377_p2 = scmp.ne.s32.totalorder %s4352_s19, 0 }
 0x69b   : > { %p3406_p11 = scmp.ne.s32.totalorder %s2714_s22, %s3405_s27  ;;  %s3483_s7 = smov [#allocation7]  }
 0x69c   : > { %s3409_s8 = sshll.u32 %s3483_s7, 4  ;;  %s3410_s8 = int_to_ptr.vmem [resolvable:$false] %s3409_s8 }
 0x69d   : > { %p3407_p3 = pnand %p3406_p11, %p4377_p2  ;;  %s3411_s28 = scalar_lea.vmem %s3410_s8, 256 }
 0x69e   : > { %p3412_p7 = scmp.lt.s32.totalorder %s2714_s22, %s3410_s8  ;;  %p3413_p8 = scmp.lt.s32.totalorder %s3411_s28, %s3405_s27 }
 0x69f   : > { %p3408_p4 = pneg %p3407_p3 }
 0x6a0   : > { %p3414_p12 = por %p3413_p8, %p3412_p7 }
 0x6a2   : > { %p3415_p0 = pnand %p3414_p12, %p3408_p4 }
 0x6a4   : > { %3418 = shalt.err (!%p3415_p0)
}
 0x6a5   : > { %s3419_s13 = scalar_lea.hbm %s4299_s17, 128  ;;  %s3423_s29 = scalar_lea.hbm %s4340_s2, 256 }
 0x6a6   : > { %p3420_p5 = scmp.ne.s32.totalorder %s4299_s17, %s3419_s13  ;;  %p3424_p9 = scmp.lt.u32.totalorder %s4299_s17, %s4340_s2 }
 0x6a7   : > { %p3425_p13 = scmp.lt.u32.totalorder %s3423_s29, %s3419_s13  ;;  %p3427_p11 = scmp.lt.u32.totalorder %s3419_s13, %s4299_s17 }
 0x6a8   : > { %p3421_p1 = pnand %p3420_p5, %p4377_p2 }
 0x6a9   : > { %p3426_p10 = por %p3425_p13, %p3424_p9 }
 0x6aa   : > { %p3422_p6 = pneg %p3421_p1 }
 0x6ab   : > { %p3428_p3 = por %p3427_p11, %p3426_p10 }
 0x6ad   : > { %p3429_p4 = pnand %p3428_p3, %p3422_p6 }
 0x6af   : > { %3432 = shalt.err (!%p3429_p4)
}
 0x6b0   : > { %3211 = dma.vmem_to_hbm [thread:$0]  (%p4377_p2), %s2714_s22, 128, %s4299_s17, %s2700_s25  }
 0x6b1 PF: > { %p3228_p7 = scmp.ge.s32.totalorder %s3475_s12, 2  ;;  %s2725_s3 = sand.u32 1, %s3463_s9  }
 0x6b2   : > { %p4378_p8 = scmp.ne.s32.totalorder %s4353_s20, 0  ;;  %s2726_s4 = scalar_lea.sflag [#allocation4], %s2725_s3 }
 0x6b4   : > { %p3221_p12 = pnand %p3228_p7, %p4378_p8 }
 0x6b6   : > { %3458 = dma.done.wait (!%p3221_p12), %s2726_s4, 128  }
 0x6b7   : > { %3460 = vsyncadd (!%p3221_p12), %s2726_s4, 4294967168  ;;  %p14_p0 = scmp.ge.s32.totalorder %s3524_s15, 4   ;;  %s4379_s9 = smov %s3467_s10 }
 0x6b8   : > { %s4380_s10 = smov %s3471_s11  ;;  %s4381_s11 = smov %s3535_s18 }
 0x6b9   : > { %s4382_s12 = smov %s3524_s15  ;;  %16 = sbr.rel (!%p14_p0) target bundleno = 5 (0x5), region = 79 }
 0x6c0   :  { %2731 = vsyncpa [#allocation3], 1 }
 0x6c1   :  { %2733 = vsyncpa [#allocation3 + $0x1], 1 }
 0x6c2   :  { %2734 = vsyncpa [#allocation6], 1 }
 0x6c3   :  { %2735 = vsyncpa [#allocation4], 1 }
 0x6c4   :  { %2737 = vsyncpa [#allocation4 + $0x1], 1 }

</bundles_post_ra>
